<compile_context>
chip_gen: v5e
topology: v5e:2x2
jax: 0.10.0
libtpu: 0.0.40
codegen_flags: <defaults>
</compile_context>

<pallas_src>
import functools

import jax
import jax.numpy as jnp
from jax import lax
from jax.experimental import pallas as pl
from jax.experimental.pallas import tpu as pltpu


def _round_up(x, m):
    return ((x + m - 1) // m) * m


# Use the single-matmul im2col form whenever the flattened contraction depth
# K*Cin_pad is at most this (v6e/v7x MXU is 256 deep; 1024 keeps the operand
# small while still covering all "Cin well below contraction depth" layers).
_IM2COL_MAX_DEPTH = 1024


# ----------------------------------------------------------------------------
# Fused kernel: L x [Conv1d(K, no bias) + folded BN + Tanh] for one batch elem.
#
# refs layout:
#   refs[0]              : x_ref   (1, Cin0, T)          NCW input block
#   refs[1 + 3*l + 0]    : w_ref_l (K*cin_pad_l, cout_pad_l)   flattened taps
#   refs[1 + 3*l + 1]    : s_ref_l (1, cout_pad_l)       folded BN scale (f32)
#   refs[1 + 3*l + 2]    : b_ref_l (1, cout_pad_l)       folded BN shift (f32)
#   refs[1 + 3*L]        : o_ref   (1, CoutL, T)          NCW output block
#   refs[2+3*L], [3+3*L] : buf_a, buf_b  VMEM scratch (n_rows, cmax_pad)
# ----------------------------------------------------------------------------
def _postnet_fused_kernel(*refs, L, K, T, lead, cin_pads, cout_pads):
    x_ref = refs[0]
    o_ref = refs[1 + 3 * L]
    buf_a = refs[2 + 3 * L]
    buf_b = refs[3 + 3 * L]
    bufs = (buf_a, buf_b)
    pad = (K - 1) // 2
    n_rows, cmax = buf_a.shape
    tail = n_rows - lead - T
    cin0 = x_ref.shape[1]
    cout_last = o_ref.shape[1]

    # Zero the halo rows of both ping-pong buffers.  The per-layer compute
    # only ever writes rows [lead, lead + T), so the halos stay zero for all
    # layers.  NOTE: intentionally NOT guarded with pl.program_id(0)==0 --
    # on multi-TensorCore parts a "parallel" batch axis may be core-sharded
    # and each core owns a private scratch copy, so first-iteration-only init
    # would leave the second core's halo uninitialized.  Cost is 2*(lead+tail)
    # rows per step, i.e. negligible.
    for buf in bufs:
        buf[pl.ds(0, lead), :] = jnp.zeros((lead, cmax), buf.dtype)
        buf[pl.ds(lead + T, tail), :] = jnp.zeros((tail, cmax), buf.dtype)

    # Stage this batch element's input: (Cin0, T) -> XLU transpose ->
    # channels-last, zero-pad channels to cin_pads[0], one aligned store.
    x_t = jnp.transpose(x_ref[0], (1, 0)).astype(buf_a.dtype)      # (T, Cin0)
    if cin_pads[0] > cin0:
        x_t = jnp.concatenate(
            [x_t, jnp.zeros((T, cin_pads[0] - cin0), buf_a.dtype)], axis=1)
    buf_a[pl.ds(lead, T), pl.ds(0, cin_pads[0])] = x_t

    src = 0
    for l in range(L):                               # static unroll over layers
        w_ref = refs[1 + 3 * l]
        s_ref = refs[2 + 3 * l]
        b_ref = refs[3 + 3 * l]
        cin_p, cout_p = cin_pads[l], cout_pads[l]

        # Load the (aligned) activation slab once; produce every conv tap via
        # an XLU sublane roll + an ALIGNED [lead:lead+T) value slice (no
        # sublane-unaligned slices -> no (T, Cin) re-layout copies).
        full = bufs[src][:, pl.ds(0, cin_p)]          # (n_rows, cin_p)

        def tap(k):
            shift = (pad - k) % n_rows
            rolled = pltpu.roll(full, shift=shift, axis=0) if shift else full
            return rolled[lead:lead + T, :]           # aligned (T, cin_p)

        if K * cin_p <= _IM2COL_MAX_DEPTH:
            # Small contraction depth: im2col -> a single MXU matmul with a
            # K*Cin-deep contraction (fills the MXU much better than 5 thin
            # matmuls).  Lane concat is aligned because cin_p % 128 == 0.
            x_cat = jnp.concatenate([tap(k) for k in range(K)], axis=1)
            acc = jnp.dot(x_cat, w_ref[...],
                          preferred_element_type=jnp.float32)
        else:
            # Full contraction depth already: K shifted MXU matmuls, f32 acc.
            acc = jnp.zeros((T, cout_p), jnp.float32)
            for k in range(K):                        # static unroll (K = 5)
                acc += jnp.dot(tap(k),
                               w_ref[pl.ds(k * cin_p, cin_p), :],
                               preferred_element_type=jnp.float32)

        # Folded BatchNorm + Tanh (Dropout is identity in eval mode).
        y = jnp.tanh(acc * s_ref[...] + b_ref[...])   # (T, cout_p) f32

        if l == L - 1:
            # Lane-dense output store: write (Cout, T) so the HBM store's last
            # (lane) dim is T and no wrapper-side transpose is needed.
            y_t = jnp.transpose(y[:, :cout_last], (1, 0))      # (CoutL, T)
            o_ref[0] = y_t.astype(o_ref.dtype)
        else:
            dst = 1 - src
            bufs[dst][pl.ds(lead, T), pl.ds(0, cout_p)] = y.astype(
                bufs[dst].dtype)
            src = dst


# ----------------------------------------------------------------------------
# Parameter preparation (done ONCE, outside the forward path).
# ----------------------------------------------------------------------------
def prepare_postnet_params(params, *, eps=1e-5, param_dtype=jnp.float32):
    """Transpose conv weights, zero-pad channels to multiples of 128, fold BN.

    Returns, per layer, a dict with:
      w     : (K*cin_pad, cout_pad) flattened-tap weights
      scale : (1, cout_pad) f32 folded BN scale
      shift : (1, cout_pad) f32 folded BN shift
      plus the original / padded channel counts.
    """
    prepared = []
    for p in params:
        w = jnp.transpose(p["w"], (2, 1, 0))        # (Cout,Cin,K) -> (K,Cin,Cout)
        K, cin, cout = w.shape
        cin_p, cout_p = _round_up(cin, 128), _round_up(cout, 128)
        w = jnp.pad(w, ((0, 0), (0, cin_p - cin), (0, cout_p - cout)))
        w = w.reshape(K * cin_p, cout_p).astype(param_dtype)
        scale = p["gamma"] / jnp.sqrt(p["var"] + eps)
        shift = p["beta"] - p["mean"] * scale
        scale = jnp.pad(scale, (0, cout_p - cout)).reshape(1, cout_p)
        shift = jnp.pad(shift, (0, cout_p - cout)).reshape(1, cout_p)
        prepared.append(dict(
            w=w, scale=scale.astype(jnp.float32), shift=shift.astype(jnp.float32),
            k=int(K), cin=int(cin), cout=int(cout),
            cin_pad=int(cin_p), cout_pad=int(cout_p)))
    return prepared


def _const_spec(shape):
    """Constant-index, single-buffered BlockSpec for per-call constants."""
    ndim = len(shape)
    index_map = lambda b, _n=ndim: (0,) * _n
    try:
        return pl.BlockSpec(shape, index_map, pipeline_mode=pl.Buffered(1))
    except TypeError:  # older API without pipeline_mode: fall back, still correct
        return pl.BlockSpec(shape, index_map)


# ----------------------------------------------------------------------------
# Forward wrapper: single fused pallas_call over the whole layer stack.
# ----------------------------------------------------------------------------
def postnet_forward_pallas(x_nct, prepared, *, K, act_dtype=None):
    """x_nct: (B, C, T) PyTorch NCW layout.  Returns (B, out_size, T)."""
    B, C, T = x_nct.shape
    L = len(prepared)
    assert C == prepared[0]["cin"], (C, prepared[0]["cin"])
    cout_last = prepared[-1]["cout"]
    cin_pads = tuple(p["cin_pad"] for p in prepared)
    cout_pads = tuple(p["cout_pad"] for p in prepared)
    cmax = max(cin_pads + cout_pads)
    pad = (K - 1) // 2
    lead = max(8, _round_up(pad, 8))                 # sublane-aligned halo >= pad
    n_rows = _round_up(lead + T + lead, 8)           # tail halo >= lead >= pad

    act_dtype = act_dtype or x_nct.dtype
    x_nct = x_nct.astype(act_dtype)
    itemsize = jnp.dtype(act_dtype).itemsize

    kernel = functools.partial(_postnet_fused_kernel, L=L, K=K, T=T, lead=lead,
                               cin_pads=cin_pads, cout_pads=cout_pads)

    flat_params = []
    in_specs = [pl.BlockSpec((1, C, T), lambda b: (b, 0, 0))]
    for p in prepared:
        flat_params += [p["w"], p["scale"], p["shift"]]
        in_specs += [_const_spec(tuple(p["w"].shape)),
                     _const_spec(tuple(p["scale"].shape)),
                     _const_spec(tuple(p["shift"].shape))]

    # --- VMEM budget (bytes): params (single-buffered) + ping-pong scratch
    #     + double-buffered in/out blocks + generous per-layer temp estimate.
    w_bytes = sum(int(p["w"].size) * p["w"].dtype.itemsize
                  + int(p["scale"].size) * 4 + int(p["shift"].size) * 4
                  for p in prepared)
    scratch_bytes = 2 * n_rows * cmax * itemsize
    io_bytes = 2 * (C * T + cout_last * T) * itemsize
    tmp_bytes = max(3 * n_rows * cp * itemsize          # slab + rolled copies
                    + T * K * cp * itemsize              # im2col worst case
                    + 2 * T * cop * 4                    # f32 acc + y
                    for cp, cop in zip(cin_pads, cout_pads))
    vmem_budget = int(1.25 * (w_bytes + scratch_bytes + io_bytes + tmp_bytes)) \
        + (4 << 20)
    try:
        vmem_cap = int(pltpu.get_tpu_info().vmem_capacity_bytes)
    except Exception:
        vmem_cap = 64 * 1024 * 1024                  # conservative (v7x) fallback
    vmem_limit = min(max(vmem_budget, 16 << 20), int(0.85 * vmem_cap))

    # Advisory cost estimate so XLA schedules around the fused call sensibly.
    flops = 2 * B * T * K * sum(ci * co for ci, co in zip(cin_pads, cout_pads))
    transcendentals = B * T * sum(cout_pads)
    bytes_accessed = int(x_nct.size * itemsize + B * T * cout_last * itemsize
                         + w_bytes)
    cost = pl.CostEstimate(flops=int(flops),
                           transcendentals=int(transcendentals),
                           bytes_accessed=bytes_accessed)

    out = pl.pallas_call(
        kernel,
        out_shape=jax.ShapeDtypeStruct((B, cout_last, T), act_dtype),
        grid_spec=pltpu.PrefetchScalarGridSpec(
            num_scalar_prefetch=0,
            grid=(B,),                                # batch elems independent
            in_specs=in_specs,
            out_specs=pl.BlockSpec((1, cout_last, T), lambda b: (b, 0, 0)),
            scratch_shapes=[
                pltpu.VMEM((n_rows, cmax), act_dtype),   # ping
                pltpu.VMEM((n_rows, cmax), act_dtype),   # pong
            ]),
        compiler_params=pltpu.CompilerParams(
            dimension_semantics=("parallel",),
            vmem_limit_bytes=int(vmem_limit)),
        cost_estimate=cost,
    )(x_nct, *flat_params)

    return out                                        # already (B, Cout, T)


# ----------------------------------------------------------------------------
# Deterministic parameter construction + pure-JAX reference.
# ----------------------------------------------------------------------------
def init_postnet_params(key, inp_size, out_size, num_conv_layers,
                        conv_channels, conv_filter_size):
    params = []
    for i in range(num_conv_layers):
        cin = inp_size if i == 0 else conv_channels
        cout = out_size if i == num_conv_layers - 1 else conv_channels
        key, kw, kg, kb, km, kv = jax.random.split(key, 6)
        # PyTorch Conv1d weight layout is (Cout, Cin, K).
        w = 0.1 * jax.random.normal(kw, (cout, cin, conv_filter_size),
                                    jnp.float32)
        gamma = 1.0 + 0.1 * jax.random.normal(kg, (cout,), jnp.float32)
        beta = 0.1 * jax.random.normal(kb, (cout,), jnp.float32)
        running_mean = 0.1 * jax.random.normal(km, (cout,), jnp.float32)
        running_var = 0.5 + jnp.abs(jax.random.normal(kv, (cout,), jnp.float32))
        params.append(dict(w=w, gamma=gamma, beta=beta,
                           mean=running_mean, var=running_var))
    return params


def postnet_forward_reference(x_nct, params, *, K, eps=1e-5):
    """Pure-JAX reference (matches PyTorch eval-mode forward of the spec)."""
    x = x_nct
    pad = (K - 1) // 2
    for p in params:
        y = lax.conv_general_dilated(
            x, p["w"], window_strides=(1,), padding=[(pad, pad)],
            dimension_numbers=("NCH", "OIH", "NCH"))
        scale = (p["gamma"] / jnp.sqrt(p["var"] + eps))[None, :, None]
        shift = (p["beta"] - p["mean"] * p["gamma"]
                 / jnp.sqrt(p["var"] + eps))[None, :, None]
        x = jnp.tanh(y * scale + shift)
    return x


if __name__ == "__main__":
    # Small, module-consistent shapes.
    B, T = 2, 16
    inp_size = 8            # e.g. small n_mels
    out_size = 8
    conv_channels = 32
    num_conv_layers = 5
    K = 5

    key = jax.random.PRNGKey(0)
    kx, kp = jax.random.split(key)
    x = jax.random.normal(kx, (B, inp_size, T), jnp.float32)   # NCW like PyTorch

    params = init_postnet_params(kp, inp_size, out_size, num_conv_layers,
                                 conv_channels, K)
    prepared = prepare_postnet_params(params)     # one-time weight/BN folding

    out = postnet_forward_pallas(x, prepared, K=K)
    out = jax.block_until_ready(out)

    ref = postnet_forward_reference(x, params, K=K)
    assert out.shape == (B, out_size, T), out.shape
    assert jnp.allclose(out, ref, atol=1e-4, rtol=1e-4), (
        float(jnp.max(jnp.abs(out - ref))))

    print("KERNEL_OK")
</pallas_src>

<mosaic_0001>
module attributes {stable_mosaic.version = 11 : i64} {
  func.func @_postnet_fused_kernel(%arg0: i32, %arg1: memref<1x8x16xf32, #tpu.memory_space<vmem>>, %arg2: memref<640x128xf32, #tpu.memory_space<vmem>>, %arg3: memref<1x128xf32, #tpu.memory_space<vmem>>, %arg4: memref<1x128xf32, #tpu.memory_space<vmem>>, %arg5: memref<640x128xf32, #tpu.memory_space<vmem>>, %arg6: memref<1x128xf32, #tpu.memory_space<vmem>>, %arg7: memref<1x128xf32, #tpu.memory_space<vmem>>, %arg8: memref<640x128xf32, #tpu.memory_space<vmem>>, %arg9: memref<1x128xf32, #tpu.memory_space<vmem>>, %arg10: memref<1x128xf32, #tpu.memory_space<vmem>>, %arg11: memref<640x128xf32, #tpu.memory_space<vmem>>, %arg12: memref<1x128xf32, #tpu.memory_space<vmem>>, %arg13: memref<1x128xf32, #tpu.memory_space<vmem>>, %arg14: memref<640x128xf32, #tpu.memory_space<vmem>>, %arg15: memref<1x128xf32, #tpu.memory_space<vmem>>, %arg16: memref<1x128xf32, #tpu.memory_space<vmem>>, %arg17: memref<1x8x16xf32, #tpu.memory_space<vmem>>, %arg18: memref<32x128xf32, #tpu.memory_space<vmem>>, %arg19: memref<32x128xf32, #tpu.memory_space<vmem>>) attributes {dimension_semantics = [#tpu.dimension_semantics<parallel>], iteration_bounds = array<i64: 2>, scalar_prefetch = 0 : i64, scratch_operands = 2 : i64, tpu.core_type = #tpu.core_type<tc>, window_params = [{transform_indices = @transform_0, window_bounds = array<i64: 1, 8, 16>}, {pipeline_mode = #tpu.pipeline_mode<synchronous>, transform_indices = @transform_1, window_bounds = array<i64: 640, 128>}, {pipeline_mode = #tpu.pipeline_mode<synchronous>, transform_indices = @transform_2, window_bounds = array<i64: 1, 128>}, {pipeline_mode = #tpu.pipeline_mode<synchronous>, transform_indices = @transform_3, window_bounds = array<i64: 1, 128>}, {pipeline_mode = #tpu.pipeline_mode<synchronous>, transform_indices = @transform_4, window_bounds = array<i64: 640, 128>}, {pipeline_mode = #tpu.pipeline_mode<synchronous>, transform_indices = @transform_5, window_bounds = array<i64: 1, 128>}, {pipeline_mode = #tpu.pipeline_mode<synchronous>, transform_indices = @transform_6, window_bounds = array<i64: 1, 128>}, {pipeline_mode = #tpu.pipeline_mode<synchronous>, transform_indices = @transform_7, window_bounds = array<i64: 640, 128>}, {pipeline_mode = #tpu.pipeline_mode<synchronous>, transform_indices = @transform_8, window_bounds = array<i64: 1, 128>}, {pipeline_mode = #tpu.pipeline_mode<synchronous>, transform_indices = @transform_9, window_bounds = array<i64: 1, 128>}, {pipeline_mode = #tpu.pipeline_mode<synchronous>, transform_indices = @transform_10, window_bounds = array<i64: 640, 128>}, {pipeline_mode = #tpu.pipeline_mode<synchronous>, transform_indices = @transform_11, window_bounds = array<i64: 1, 128>}, {pipeline_mode = #tpu.pipeline_mode<synchronous>, transform_indices = @transform_12, window_bounds = array<i64: 1, 128>}, {pipeline_mode = #tpu.pipeline_mode<synchronous>, transform_indices = @transform_13, window_bounds = array<i64: 640, 128>}, {pipeline_mode = #tpu.pipeline_mode<synchronous>, transform_indices = @transform_14, window_bounds = array<i64: 1, 128>}, {pipeline_mode = #tpu.pipeline_mode<synchronous>, transform_indices = @transform_15, window_bounds = array<i64: 1, 128>}, {transform_indices = @transform_16, window_bounds = array<i64: 1, 8, 16>}]} {
    %cst = arith.constant 0.000000e+00 : f32
    %0 = vector.broadcast %cst : f32 to vector<8x128xf32>
    %c0 = arith.constant 0 : index
    %c0_0 = arith.constant 0 : index
    %1 = vector.load %arg18[%c0, %c0_0] : memref<32x128xf32, #tpu.memory_space<vmem>>, vector<8x128xf32>
    tpu.vector_store %arg18[%c0, %c0_0], %0 {strides = array<i32>} : memref<32x128xf32, #tpu.memory_space<vmem>>, vector<8x128xf32>,
    %cst_1 = arith.constant 0.000000e+00 : f32
    %2 = vector.broadcast %cst_1 : f32 to vector<8x128xf32>
    %c24 = arith.constant 24 : index
    %c0_2 = arith.constant 0 : index
    %3 = vector.load %arg18[%c24, %c0_2] : memref<32x128xf32, #tpu.memory_space<vmem>>, vector<8x128xf32>
    tpu.vector_store %arg18[%c24, %c0_2], %2 {strides = array<i32>} : memref<32x128xf32, #tpu.memory_space<vmem>>, vector<8x128xf32>,
    %cst_3 = arith.constant 0.000000e+00 : f32
    %4 = vector.broadcast %cst_3 : f32 to vector<8x128xf32>
    %c0_4 = arith.constant 0 : index
    %c0_5 = arith.constant 0 : index
    %5 = vector.load %arg19[%c0_4, %c0_5] : memref<32x128xf32, #tpu.memory_space<vmem>>, vector<8x128xf32>
    tpu.vector_store %arg19[%c0_4, %c0_5], %4 {strides = array<i32>} : memref<32x128xf32, #tpu.memory_space<vmem>>, vector<8x128xf32>,
    %cst_6 = arith.constant 0.000000e+00 : f32
    %6 = vector.broadcast %cst_6 : f32 to vector<8x128xf32>
    %c24_7 = arith.constant 24 : index
    %c0_8 = arith.constant 0 : index
    %7 = vector.load %arg19[%c24_7, %c0_8] : memref<32x128xf32, #tpu.memory_space<vmem>>, vector<8x128xf32>
    tpu.vector_store %arg19[%c24_7, %c0_8], %6 {strides = array<i32>} : memref<32x128xf32, #tpu.memory_space<vmem>>, vector<8x128xf32>,
    %c0_9 = arith.constant 0 : index
    %c0_10 = arith.constant 0 : index
    %c0_11 = arith.constant 0 : index
    %8 = vector.load %arg1[%c0_9, %c0_10, %c0_11] : memref<1x8x16xf32, #tpu.memory_space<vmem>>, vector<1x8x16xf32>
    %9 = vector.shape_cast %8 : vector<1x8x16xf32> to vector<8x16xf32>
    %10 = tpu.transpose %9, [1, 0] : vector<8x16xf32> -> vector<16x8xf32>
    %cst_12 = arith.constant 0.000000e+00 : f32
    %11 = vector.broadcast %cst_12 : f32 to vector<16x120xf32>
    %12 = tpu.concatenate %10, %11 in 1 : vector<16x8xf32>, vector<16x120xf32> -> vector<16x128xf32>
    %c8 = arith.constant 8 : index
    %c0_13 = arith.constant 0 : index
    %13 = vector.load %arg18[%c8, %c0_13] : memref<32x128xf32, #tpu.memory_space<vmem>>, vector<16x128xf32>
    tpu.vector_store %arg18[%c8, %c0_13], %12 {strides = array<i32>} : memref<32x128xf32, #tpu.memory_space<vmem>>, vector<16x128xf32>,
    %c0_14 = arith.constant 0 : index
    %c0_15 = arith.constant 0 : index
    %14 = vector.load %arg18[%c0_14, %c0_15] : memref<32x128xf32, #tpu.memory_space<vmem>>, vector<32x128xf32>
    %c2_i32 = arith.constant 2 : i32
    %15 = tpu.dynamic_rotate %14 by %c2_i32 dim 0 : vector<32x128xf32>, i32 -> vector<32x128xf32>
    %16 = vector.extract_strided_slice %15 {offsets = [8, 0], sizes = [16, 128], strides = [1, 1]} : vector<32x128xf32> to vector<16x128xf32>
    %c1_i32 = arith.constant 1 : i32
    %17 = tpu.dynamic_rotate %14 by %c1_i32 dim 0 : vector<32x128xf32>, i32 -> vector<32x128xf32>
    %18 = vector.extract_strided_slice %17 {offsets = [8, 0], sizes = [16, 128], strides = [1, 1]} : vector<32x128xf32> to vector<16x128xf32>
    %19 = vector.extract_strided_slice %14 {offsets = [8, 0], sizes = [16, 128], strides = [1, 1]} : vector<32x128xf32> to vector<16x128xf32>
    %c31_i32 = arith.constant 31 : i32
    %20 = tpu.dynamic_rotate %14 by %c31_i32 dim 0 : vector<32x128xf32>, i32 -> vector<32x128xf32>
    %21 = vector.extract_strided_slice %20 {offsets = [8, 0], sizes = [16, 128], strides = [1, 1]} : vector<32x128xf32> to vector<16x128xf32>
    %c30_i32 = arith.constant 30 : i32
    %22 = tpu.dynamic_rotate %14 by %c30_i32 dim 0 : vector<32x128xf32>, i32 -> vector<32x128xf32>
    %23 = vector.extract_strided_slice %22 {offsets = [8, 0], sizes = [16, 128], strides = [1, 1]} : vector<32x128xf32> to vector<16x128xf32>
    %24 = tpu.concatenate %16, %18, %19, %21, %23 in 1 : vector<16x128xf32>, vector<16x128xf32>, vector<16x128xf32>, vector<16x128xf32>, vector<16x128xf32> -> vector<16x640xf32>
    %c0_16 = arith.constant 0 : index
    %c0_17 = arith.constant 0 : index
    %25 = vector.load %arg2[%c0_16, %c0_17] : memref<640x128xf32, #tpu.memory_space<vmem>>, vector<640x128xf32>
    %cst_18 = arith.constant dense<0.000000e+00> : vector<16x128xf32>
    %26 = tpu.matmul %24, %25, %cst_18 {dimension_numbers = #tpu.dot_dimension_numbers<[1], [0], [0], [1], [0, 0, 1, 1], [], []>} : vector<16x640xf32>, vector<640x128xf32>, vector<16x128xf32> -> vector<16x128xf32>
    %c0_19 = arith.constant 0 : index
    %c0_20 = arith.constant 0 : index
    %27 = vector.load %arg3[%c0_19, %c0_20] : memref<1x128xf32, #tpu.memory_space<vmem>>, vector<1x128xf32>
    %28 = vector.broadcast %27 : vector<1x128xf32> to vector<16x128xf32>
    %29 = arith.mulf %26, %28 : vector<16x128xf32>
    %c0_21 = arith.constant 0 : index
    %c0_22 = arith.constant 0 : index
    %30 = vector.load %arg4[%c0_21, %c0_22] : memref<1x128xf32, #tpu.memory_space<vmem>>, vector<1x128xf32>
    %31 = vector.broadcast %30 : vector<1x128xf32> to vector<16x128xf32>
    %32 = arith.addf %29, %31 : vector<16x128xf32>
    %33 = math.tanh %32 : vector<16x128xf32>
    %c8_23 = arith.constant 8 : index
    %c0_24 = arith.constant 0 : index
    %34 = vector.load %arg19[%c8_23, %c0_24] : memref<32x128xf32, #tpu.memory_space<vmem>>, vector<16x128xf32>
    tpu.vector_store %arg19[%c8_23, %c0_24], %33 {strides = array<i32>} : memref<32x128xf32, #tpu.memory_space<vmem>>, vector<16x128xf32>,
    %c0_25 = arith.constant 0 : index
    %c0_26 = arith.constant 0 : index
    %35 = vector.load %arg19[%c0_25, %c0_26] : memref<32x128xf32, #tpu.memory_space<vmem>>, vector<32x128xf32>
    %c2_i32_27 = arith.constant 2 : i32
    %36 = tpu.dynamic_rotate %35 by %c2_i32_27 dim 0 : vector<32x128xf32>, i32 -> vector<32x128xf32>
    %37 = vector.extract_strided_slice %36 {offsets = [8, 0], sizes = [16, 128], strides = [1, 1]} : vector<32x128xf32> to vector<16x128xf32>
    %c1_i32_28 = arith.constant 1 : i32
    %38 = tpu.dynamic_rotate %35 by %c1_i32_28 dim 0 : vector<32x128xf32>, i32 -> vector<32x128xf32>
    %39 = vector.extract_strided_slice %38 {offsets = [8, 0], sizes = [16, 128], strides = [1, 1]} : vector<32x128xf32> to vector<16x128xf32>
    %40 = vector.extract_strided_slice %35 {offsets = [8, 0], sizes = [16, 128], strides = [1, 1]} : vector<32x128xf32> to vector<16x128xf32>
    %c31_i32_29 = arith.constant 31 : i32
    %41 = tpu.dynamic_rotate %35 by %c31_i32_29 dim 0 : vector<32x128xf32>, i32 -> vector<32x128xf32>
    %42 = vector.extract_strided_slice %41 {offsets = [8, 0], sizes = [16, 128], strides = [1, 1]} : vector<32x128xf32> to vector<16x128xf32>
    %c30_i32_30 = arith.constant 30 : i32
    %43 = tpu.dynamic_rotate %35 by %c30_i32_30 dim 0 : vector<32x128xf32>, i32 -> vector<32x128xf32>
    %44 = vector.extract_strided_slice %43 {offsets = [8, 0], sizes = [16, 128], strides = [1, 1]} : vector<32x128xf32> to vector<16x128xf32>
    %45 = tpu.concatenate %37, %39, %40, %42, %44 in 1 : vector<16x128xf32>, vector<16x128xf32>, vector<16x128xf32>, vector<16x128xf32>, vector<16x128xf32> -> vector<16x640xf32>
    %c0_31 = arith.constant 0 : index
    %c0_32 = arith.constant 0 : index
    %46 = vector.load %arg5[%c0_31, %c0_32] : memref<640x128xf32, #tpu.memory_space<vmem>>, vector<640x128xf32>
    %cst_33 = arith.constant dense<0.000000e+00> : vector<16x128xf32>
    %47 = tpu.matmul %45, %46, %cst_33 {dimension_numbers = #tpu.dot_dimension_numbers<[1], [0], [0], [1], [0, 0, 1, 1], [], []>} : vector<16x640xf32>, vector<640x128xf32>, vector<16x128xf32> -> vector<16x128xf32>
    %c0_34 = arith.constant 0 : index
    %c0_35 = arith.constant 0 : index
    %48 = vector.load %arg6[%c0_34, %c0_35] : memref<1x128xf32, #tpu.memory_space<vmem>>, vector<1x128xf32>
    %49 = vector.broadcast %48 : vector<1x128xf32> to vector<16x128xf32>
    %50 = arith.mulf %47, %49 : vector<16x128xf32>
    %c0_36 = arith.constant 0 : index
    %c0_37 = arith.constant 0 : index
    %51 = vector.load %arg7[%c0_36, %c0_37] : memref<1x128xf32, #tpu.memory_space<vmem>>, vector<1x128xf32>
    %52 = vector.broadcast %51 : vector<1x128xf32> to vector<16x128xf32>
    %53 = arith.addf %50, %52 : vector<16x128xf32>
    %54 = math.tanh %53 : vector<16x128xf32>
    %c8_38 = arith.constant 8 : index
    %c0_39 = arith.constant 0 : index
    %55 = vector.load %arg18[%c8_38, %c0_39] : memref<32x128xf32, #tpu.memory_space<vmem>>, vector<16x128xf32>
    tpu.vector_store %arg18[%c8_38, %c0_39], %54 {strides = array<i32>} : memref<32x128xf32, #tpu.memory_space<vmem>>, vector<16x128xf32>,
    %c0_40 = arith.constant 0 : index
    %c0_41 = arith.constant 0 : index
    %56 = vector.load %arg18[%c0_40, %c0_41] : memref<32x128xf32, #tpu.memory_space<vmem>>, vector<32x128xf32>
    %c2_i32_42 = arith.constant 2 : i32
    %57 = tpu.dynamic_rotate %56 by %c2_i32_42 dim 0 : vector<32x128xf32>, i32 -> vector<32x128xf32>
    %58 = vector.extract_strided_slice %57 {offsets = [8, 0], sizes = [16, 128], strides = [1, 1]} : vector<32x128xf32> to vector<16x128xf32>
    %c1_i32_43 = arith.constant 1 : i32
    %59 = tpu.dynamic_rotate %56 by %c1_i32_43 dim 0 : vector<32x128xf32>, i32 -> vector<32x128xf32>
    %60 = vector.extract_strided_slice %59 {offsets = [8, 0], sizes = [16, 128], strides = [1, 1]} : vector<32x128xf32> to vector<16x128xf32>
    %61 = vector.extract_strided_slice %56 {offsets = [8, 0], sizes = [16, 128], strides = [1, 1]} : vector<32x128xf32> to vector<16x128xf32>
    %c31_i32_44 = arith.constant 31 : i32
    %62 = tpu.dynamic_rotate %56 by %c31_i32_44 dim 0 : vector<32x128xf32>, i32 -> vector<32x128xf32>
    %63 = vector.extract_strided_slice %62 {offsets = [8, 0], sizes = [16, 128], strides = [1, 1]} : vector<32x128xf32> to vector<16x128xf32>
    %c30_i32_45 = arith.constant 30 : i32
    %64 = tpu.dynamic_rotate %56 by %c30_i32_45 dim 0 : vector<32x128xf32>, i32 -> vector<32x128xf32>
    %65 = vector.extract_strided_slice %64 {offsets = [8, 0], sizes = [16, 128], strides = [1, 1]} : vector<32x128xf32> to vector<16x128xf32>
    %66 = tpu.concatenate %58, %60, %61, %63, %65 in 1 : vector<16x128xf32>, vector<16x128xf32>, vector<16x128xf32>, vector<16x128xf32>, vector<16x128xf32> -> vector<16x640xf32>
    %c0_46 = arith.constant 0 : index
    %c0_47 = arith.constant 0 : index
    %67 = vector.load %arg8[%c0_46, %c0_47] : memref<640x128xf32, #tpu.memory_space<vmem>>, vector<640x128xf32>
    %cst_48 = arith.constant dense<0.000000e+00> : vector<16x128xf32>
    %68 = tpu.matmul %66, %67, %cst_48 {dimension_numbers = #tpu.dot_dimension_numbers<[1], [0], [0], [1], [0, 0, 1, 1], [], []>} : vector<16x640xf32>, vector<640x128xf32>, vector<16x128xf32> -> vector<16x128xf32>
    %c0_49 = arith.constant 0 : index
    %c0_50 = arith.constant 0 : index
    %69 = vector.load %arg9[%c0_49, %c0_50] : memref<1x128xf32, #tpu.memory_space<vmem>>, vector<1x128xf32>
    %70 = vector.broadcast %69 : vector<1x128xf32> to vector<16x128xf32>
    %71 = arith.mulf %68, %70 : vector<16x128xf32>
    %c0_51 = arith.constant 0 : index
    %c0_52 = arith.constant 0 : index
    %72 = vector.load %arg10[%c0_51, %c0_52] : memref<1x128xf32, #tpu.memory_space<vmem>>, vector<1x128xf32>
    %73 = vector.broadcast %72 : vector<1x128xf32> to vector<16x128xf32>
    %74 = arith.addf %71, %73 : vector<16x128xf32>
    %75 = math.tanh %74 : vector<16x128xf32>
    %c8_53 = arith.constant 8 : index
    %c0_54 = arith.constant 0 : index
    %76 = vector.load %arg19[%c8_53, %c0_54] : memref<32x128xf32, #tpu.memory_space<vmem>>, vector<16x128xf32>
    tpu.vector_store %arg19[%c8_53, %c0_54], %75 {strides = array<i32>} : memref<32x128xf32, #tpu.memory_space<vmem>>, vector<16x128xf32>,
    %c0_55 = arith.constant 0 : index
    %c0_56 = arith.constant 0 : index
    %77 = vector.load %arg19[%c0_55, %c0_56] : memref<32x128xf32, #tpu.memory_space<vmem>>, vector<32x128xf32>
    %c2_i32_57 = arith.constant 2 : i32
    %78 = tpu.dynamic_rotate %77 by %c2_i32_57 dim 0 : vector<32x128xf32>, i32 -> vector<32x128xf32>
    %79 = vector.extract_strided_slice %78 {offsets = [8, 0], sizes = [16, 128], strides = [1, 1]} : vector<32x128xf32> to vector<16x128xf32>
    %c1_i32_58 = arith.constant 1 : i32
    %80 = tpu.dynamic_rotate %77 by %c1_i32_58 dim 0 : vector<32x128xf32>, i32 -> vector<32x128xf32>
    %81 = vector.extract_strided_slice %80 {offsets = [8, 0], sizes = [16, 128], strides = [1, 1]} : vector<32x128xf32> to vector<16x128xf32>
    %82 = vector.extract_strided_slice %77 {offsets = [8, 0], sizes = [16, 128], strides = [1, 1]} : vector<32x128xf32> to vector<16x128xf32>
    %c31_i32_59 = arith.constant 31 : i32
    %83 = tpu.dynamic_rotate %77 by %c31_i32_59 dim 0 : vector<32x128xf32>, i32 -> vector<32x128xf32>
    %84 = vector.extract_strided_slice %83 {offsets = [8, 0], sizes = [16, 128], strides = [1, 1]} : vector<32x128xf32> to vector<16x128xf32>
    %c30_i32_60 = arith.constant 30 : i32
    %85 = tpu.dynamic_rotate %77 by %c30_i32_60 dim 0 : vector<32x128xf32>, i32 -> vector<32x128xf32>
    %86 = vector.extract_strided_slice %85 {offsets = [8, 0], sizes = [16, 128], strides = [1, 1]} : vector<32x128xf32> to vector<16x128xf32>
    %87 = tpu.concatenate %79, %81, %82, %84, %86 in 1 : vector<16x128xf32>, vector<16x128xf32>, vector<16x128xf32>, vector<16x128xf32>, vector<16x128xf32> -> vector<16x640xf32>
    %c0_61 = arith.constant 0 : index
    %c0_62 = arith.constant 0 : index
    %88 = vector.load %arg11[%c0_61, %c0_62] : memref<640x128xf32, #tpu.memory_space<vmem>>, vector<640x128xf32>
    %cst_63 = arith.constant dense<0.000000e+00> : vector<16x128xf32>
    %89 = tpu.matmul %87, %88, %cst_63 {dimension_numbers = #tpu.dot_dimension_numbers<[1], [0], [0], [1], [0, 0, 1, 1], [], []>} : vector<16x640xf32>, vector<640x128xf32>, vector<16x128xf32> -> vector<16x128xf32>
    %c0_64 = arith.constant 0 : index
    %c0_65 = arith.constant 0 : index
    %90 = vector.load %arg12[%c0_64, %c0_65] : memref<1x128xf32, #tpu.memory_space<vmem>>, vector<1x128xf32>
    %91 = vector.broadcast %90 : vector<1x128xf32> to vector<16x128xf32>
    %92 = arith.mulf %89, %91 : vector<16x128xf32>
    %c0_66 = arith.constant 0 : index
    %c0_67 = arith.constant 0 : index
    %93 = vector.load %arg13[%c0_66, %c0_67] : memref<1x128xf32, #tpu.memory_space<vmem>>, vector<1x128xf32>
    %94 = vector.broadcast %93 : vector<1x128xf32> to vector<16x128xf32>
    %95 = arith.addf %92, %94 : vector<16x128xf32>
    %96 = math.tanh %95 : vector<16x128xf32>
    %c8_68 = arith.constant 8 : index
    %c0_69 = arith.constant 0 : index
    %97 = vector.load %arg18[%c8_68, %c0_69] : memref<32x128xf32, #tpu.memory_space<vmem>>, vector<16x128xf32>
    tpu.vector_store %arg18[%c8_68, %c0_69], %96 {strides = array<i32>} : memref<32x128xf32, #tpu.memory_space<vmem>>, vector<16x128xf32>,
    %c0_70 = arith.constant 0 : index
    %c0_71 = arith.constant 0 : index
    %98 = vector.load %arg18[%c0_70, %c0_71] : memref<32x128xf32, #tpu.memory_space<vmem>>, vector<32x128xf32>
    %c2_i32_72 = arith.constant 2 : i32
    %99 = tpu.dynamic_rotate %98 by %c2_i32_72 dim 0 : vector<32x128xf32>, i32 -> vector<32x128xf32>
    %100 = vector.extract_strided_slice %99 {offsets = [8, 0], sizes = [16, 128], strides = [1, 1]} : vector<32x128xf32> to vector<16x128xf32>
    %c1_i32_73 = arith.constant 1 : i32
    %101 = tpu.dynamic_rotate %98 by %c1_i32_73 dim 0 : vector<32x128xf32>, i32 -> vector<32x128xf32>
    %102 = vector.extract_strided_slice %101 {offsets = [8, 0], sizes = [16, 128], strides = [1, 1]} : vector<32x128xf32> to vector<16x128xf32>
    %103 = vector.extract_strided_slice %98 {offsets = [8, 0], sizes = [16, 128], strides = [1, 1]} : vector<32x128xf32> to vector<16x128xf32>
    %c31_i32_74 = arith.constant 31 : i32
    %104 = tpu.dynamic_rotate %98 by %c31_i32_74 dim 0 : vector<32x128xf32>, i32 -> vector<32x128xf32>
    %105 = vector.extract_strided_slice %104 {offsets = [8, 0], sizes = [16, 128], strides = [1, 1]} : vector<32x128xf32> to vector<16x128xf32>
    %c30_i32_75 = arith.constant 30 : i32
    %106 = tpu.dynamic_rotate %98 by %c30_i32_75 dim 0 : vector<32x128xf32>, i32 -> vector<32x128xf32>
    %107 = vector.extract_strided_slice %106 {offsets = [8, 0], sizes = [16, 128], strides = [1, 1]} : vector<32x128xf32> to vector<16x128xf32>
    %108 = tpu.concatenate %100, %102, %103, %105, %107 in 1 : vector<16x128xf32>, vector<16x128xf32>, vector<16x128xf32>, vector<16x128xf32>, vector<16x128xf32> -> vector<16x640xf32>
    %c0_76 = arith.constant 0 : index
    %c0_77 = arith.constant 0 : index
    %109 = vector.load %arg14[%c0_76, %c0_77] : memref<640x128xf32, #tpu.memory_space<vmem>>, vector<640x128xf32>
    %cst_78 = arith.constant dense<0.000000e+00> : vector<16x128xf32>
    %110 = tpu.matmul %108, %109, %cst_78 {dimension_numbers = #tpu.dot_dimension_numbers<[1], [0], [0], [1], [0, 0, 1, 1], [], []>} : vector<16x640xf32>, vector<640x128xf32>, vector<16x128xf32> -> vector<16x128xf32>
    %c0_79 = arith.constant 0 : index
    %c0_80 = arith.constant 0 : index
    %111 = vector.load %arg15[%c0_79, %c0_80] : memref<1x128xf32, #tpu.memory_space<vmem>>, vector<1x128xf32>
    %112 = vector.broadcast %111 : vector<1x128xf32> to vector<16x128xf32>
    %113 = arith.mulf %110, %112 : vector<16x128xf32>
    %c0_81 = arith.constant 0 : index
    %c0_82 = arith.constant 0 : index
    %114 = vector.load %arg16[%c0_81, %c0_82] : memref<1x128xf32, #tpu.memory_space<vmem>>, vector<1x128xf32>
    %115 = vector.broadcast %114 : vector<1x128xf32> to vector<16x128xf32>
    %116 = arith.addf %113, %115 : vector<16x128xf32>
    %117 = math.tanh %116 : vector<16x128xf32>
    %118 = vector.extract_strided_slice %117 {offsets = [0, 0], sizes = [16, 8], strides = [1, 1]} : vector<16x128xf32> to vector<16x8xf32>
    %119 = tpu.transpose %118, [1, 0] : vector<16x8xf32> -> vector<8x16xf32>
    %c0_83 = arith.constant 0 : index
    %c0_84 = arith.constant 0 : index
    %c0_85 = arith.constant 0 : index
    %120 = vector.load %arg17[%c0_83, %c0_84, %c0_85] : memref<1x8x16xf32, #tpu.memory_space<vmem>>, vector<1x8x16xf32>
    %121 = vector.shape_cast %120 : vector<1x8x16xf32> to vector<8x16xf32>
    %122 = vector.shape_cast %119 : vector<8x16xf32> to vector<1x8x16xf32>
    tpu.vector_store %arg17[%c0_83, %c0_84, %c0_85], %122 {strides = array<i32>} : memref<1x8x16xf32, #tpu.memory_space<vmem>>, vector<1x8x16xf32>,
    return
  }
  func.func @transform_0(%arg0: i32) -> (i32, i32, i32) {
    %c0_i32 = arith.constant 0 : i32
    %c0_i32_0 = arith.constant 0 : i32
    %c0_i32_1 = arith.constant 0 : i32
    return %arg0, %c0_i32, %c0_i32_0 : i32, i32, i32
  }
  func.func @transform_1(%arg0: i32) -> (i32, i32) {
    %c0_i32 = arith.constant 0 : i32
    %c0_i32_0 = arith.constant 0 : i32
    %c0_i32_1 = arith.constant 0 : i32
    return %c0_i32, %c0_i32_0 : i32, i32
  }
  func.func @transform_2(%arg0: i32) -> (i32, i32) {
    %c0_i32 = arith.constant 0 : i32
    %c0_i32_0 = arith.constant 0 : i32
    %c0_i32_1 = arith.constant 0 : i32
    return %c0_i32, %c0_i32_0 : i32, i32
  }
  func.func @transform_3(%arg0: i32) -> (i32, i32) {
    %c0_i32 = arith.constant 0 : i32
    %c0_i32_0 = arith.constant 0 : i32
    %c0_i32_1 = arith.constant 0 : i32
    return %c0_i32, %c0_i32_0 : i32, i32
  }
  func.func @transform_4(%arg0: i32) -> (i32, i32) {
    %c0_i32 = arith.constant 0 : i32
    %c0_i32_0 = arith.constant 0 : i32
    %c0_i32_1 = arith.constant 0 : i32
    return %c0_i32, %c0_i32_0 : i32, i32
  }
  func.func @transform_5(%arg0: i32) -> (i32, i32) {
    %c0_i32 = arith.constant 0 : i32
    %c0_i32_0 = arith.constant 0 : i32
    %c0_i32_1 = arith.constant 0 : i32
    return %c0_i32, %c0_i32_0 : i32, i32
  }
  func.func @transform_6(%arg0: i32) -> (i32, i32) {
    %c0_i32 = arith.constant 0 : i32
    %c0_i32_0 = arith.constant 0 : i32
    %c0_i32_1 = arith.constant 0 : i32
    return %c0_i32, %c0_i32_0 : i32, i32
  }
  func.func @transform_7(%arg0: i32) -> (i32, i32) {
    %c0_i32 = arith.constant 0 : i32
    %c0_i32_0 = arith.constant 0 : i32
    %c0_i32_1 = arith.constant 0 : i32
    return %c0_i32, %c0_i32_0 : i32, i32
  }
  func.func @transform_8(%arg0: i32) -> (i32, i32) {
    %c0_i32 = arith.constant 0 : i32
    %c0_i32_0 = arith.constant 0 : i32
    %c0_i32_1 = arith.constant 0 : i32
    return %c0_i32, %c0_i32_0 : i32, i32
  }
  func.func @transform_9(%arg0: i32) -> (i32, i32) {
    %c0_i32 = arith.constant 0 : i32
    %c0_i32_0 = arith.constant 0 : i32
    %c0_i32_1 = arith.constant 0 : i32
    return %c0_i32, %c0_i32_0 : i32, i32
  }
  func.func @transform_10(%arg0: i32) -> (i32, i32) {
    %c0_i32 = arith.constant 0 : i32
    %c0_i32_0 = arith.constant 0 : i32
    %c0_i32_1 = arith.constant 0 : i32
    return %c0_i32, %c0_i32_0 : i32, i32
  }
  func.func @transform_11(%arg0: i32) -> (i32, i32) {
    %c0_i32 = arith.constant 0 : i32
    %c0_i32_0 = arith.constant 0 : i32
    %c0_i32_1 = arith.constant 0 : i32
    return %c0_i32, %c0_i32_0 : i32, i32
  }
  func.func @transform_12(%arg0: i32) -> (i32, i32) {
    %c0_i32 = arith.constant 0 : i32
    %c0_i32_0 = arith.constant 0 : i32
    %c0_i32_1 = arith.constant 0 : i32
    return %c0_i32, %c0_i32_0 : i32, i32
  }
  func.func @transform_13(%arg0: i32) -> (i32, i32) {
    %c0_i32 = arith.constant 0 : i32
    %c0_i32_0 = arith.constant 0 : i32
    %c0_i32_1 = arith.constant 0 : i32
    return %c0_i32, %c0_i32_0 : i32, i32
  }
  func.func @transform_14(%arg0: i32) -> (i32, i32) {
    %c0_i32 = arith.constant 0 : i32
    %c0_i32_0 = arith.constant 0 : i32
    %c0_i32_1 = arith.constant 0 : i32
    return %c0_i32, %c0_i32_0 : i32, i32
  }
  func.func @transform_15(%arg0: i32) -> (i32, i32) {
    %c0_i32 = arith.constant 0 : i32
    %c0_i32_0 = arith.constant 0 : i32
    %c0_i32_1 = arith.constant 0 : i32
    return %c0_i32, %c0_i32_0 : i32, i32
  }
  func.func @transform_16(%arg0: i32) -> (i32, i32, i32) {
    %c0_i32 = arith.constant 0 : i32
    %c0_i32_0 = arith.constant 0 : i32
    %c0_i32_1 = arith.constant 0 : i32
    return %arg0, %c0_i32, %c0_i32_0 : i32, i32, i32
  }
}

</mosaic_0001>

<bundles_post_ra>
// kernel: tpu_custom_call.1
= control target key start
LH: loop header
LB: loop body
LE: loop exit
PB: predicated region body
PF: predicated region fallthrough
CT: control target
= control target key end

     0   :  { %s2856_s0 = inlined_call_operand.hbm [shape: f32[2,8,16], index: 0, kind: input, shape index: {}]   ;;  %s2857_s1 = inlined_call_operand.hbm [shape: f32[640,128], index: 1, kind: input, shape index: {}]   ;;  %s2858_s2 = inlined_call_operand.vmem [shape: f32[1,128], index: 2, kind: input, shape index: {}]   ;;  %s2859_s3 = inlined_call_operand.vmem [shape: f32[1,128], index: 3, kind: input, shape index: {}]   ;;  %s2860_s4 = inlined_call_operand.hbm [shape: f32[640,128], index: 4, kind: input, shape index: {}]   ;;  %s2861_s5 = inlined_call_operand.vmem [shape: f32[1,128], index: 5, kind: input, shape index: {}]   ;;  %s2862_s6 = inlined_call_operand.vmem [shape: f32[1,128], index: 6, kind: input, shape index: {}]   ;;  %s2863_s7 = inlined_call_operand.hbm [shape: f32[640,128], index: 7, kind: input, shape index: {}]   ;;  %s2864_s8 = inlined_call_operand.vmem [shape: f32[1,128], index: 8, kind: input, shape index: {}]   ;;  %s2865_s9 = inlined_call_operand.vmem [shape: f32[1,128], index: 9, kind: input, shape index: {}]   ;;  %s2866_s10 = inlined_call_operand.hbm [shape: f32[640,128], index: 10, kind: input, shape index: {}]   ;;  %s2867_s11 = inlined_call_operand.vmem [shape: f32[1,128], index: 11, kind: input, shape index: {}]   ;;  %s2868_s12 = inlined_call_operand.vmem [shape: f32[1,128], index: 12, kind: input, shape index: {}]   ;;  %s2869_s13 = inlined_call_operand.hbm [shape: f32[640,128], index: 13, kind: input, shape index: {}]   ;;  %s2870_s14 = inlined_call_operand.vmem [shape: f32[1,128], index: 14, kind: input, shape index: {}]   ;;  %s2871_s15 = inlined_call_operand.vmem [shape: f32[1,128], index: 15, kind: input, shape index: {}]   ;;  %s2872_s16 = inlined_call_operand.hbm [shape: f32[2,8,16], index: 16, kind: output, shape index: {}]  }
   0x1   :  { %2875 = sst [smem:[#allocation22_spill]] %s2856_s0 }
   0x2   :  { %2876 = sst [smem:[#allocation23_spill]] %s2857_s1 }
   0x3   :  { %2877 = sst [smem:[#allocation24_spill]] %s2860_s4 }
   0x4   :  { %2878 = sst [smem:[#allocation25_spill]] %s2863_s7 }
   0x5   :  { %2879 = sst [smem:[#allocation26_spill]] %s2866_s10 }
   0x6   :  { %2880 = sst [smem:[#allocation27_spill]] %s2868_s12 }
   0x7   :  { %2881 = sst [smem:[#allocation28_spill]] %s2869_s13 }
   0x8   :  { %2882 = sst [smem:[#allocation29_spill]] %s2870_s14 }
   0x9   :  { %2883 = sst [smem:[#allocation30_spill]] %s2871_s15 }
   0xa   :  { %2884 = sst [smem:[#allocation31_spill]] %s2872_s16 }
   0xb   :  { %21 = vsyncpa [#allocation5], 0 }
   0xc   :  { %23 = vsyncpa [#allocation5 + $0x1], 0 }
   0xd   :  { %24 = vsyncpa [#allocation8], 0 }
   0xe   :  { %25 = vsyncpa [#allocation11], 0 }
   0xf   :  { %26 = vsyncpa [#allocation14], 0 }
  0x10   :  { %27 = vsyncpa [#allocation6], 0 }
  0x11   :  { %29 = vsyncpa [#allocation6 + $0x1], 0  ;;  %s2534_s21 = smov 0   ;;  %s2536_s22 = smov 0  }
  0x12   :  { %s2538_s23 = smov 0   ;;  %s2540_s24 = smov 0  }
  0x13 LB: > { %s2885_s1 = sld [smem:[#allocation23_spill]]  ;;  %s2558_s28 = sadd.s32 4294967295, %s2439_s24   ;;  %s2439_s24 = sphi %s2540_s24, %s2907_s24   ;;  %s2435_s23 = sphi %s2538_s23, %s2906_s23   ;;  %s2431_s22 = sphi %s2536_s22, %s2905_s22   ;;  %s2427_s21 = sphi %s2534_s21, %s2904_s21  }
  0x14   : > { %p2012_p0 = scmp.ge.s32.totalorder %s2439_s24, 1  ;;  %p56_p1 = scmp.eq.s32.totalorder %s2558_s28, 0 }
  0x15   : > { %p407_p2 = scmp.lt.s32.totalorder %s2439_s24, 3  ;;  %s2441_s30 = smov [#allocation7]  }
  0x16   : > { %s420_s0 = sshll.u32 %s2441_s30, 4  ;;  %s2887_s7 = sld [smem:[#allocation25_spill]]  ;;  %s421_s0 = int_to_ptr.vmem [resolvable:$true] %s420_s0 }
  0x17   : > { %p2563_p3 = pnand %p2012_p0, %p407_p2  ;;  %s2889_s4 = sld [smem:[#allocation24_spill]] }
  0x18   : > { %s2443_s15 = smov 128   ;;  %s2444_s14 = smov 8  }
  0x19   : > { %s418_s27 = sshll.u32 %s2885_s1, 4  ;;  %p2075_p4 = pneg %p2563_p3  ;;  %s419_s27 = int_to_ptr.hbm [resolvable:$true] %s418_s27 }
  0x1a   : > { %s2442_s1 = smov [#allocation10]   ;;  %s2890_s10 = sld [smem:[#allocation26_spill]] }
  0x1b   : > { %p2575_p6 = pnand %p2075_p4, %p56_p1  ;;  %s460_s16 = sshll.u32 %s2442_s1, 4  ;;  %s461_s16 = int_to_ptr.vmem [resolvable:$true] %s460_s16 }
  0x1c   : > { %s458_s19 = sshll.u32 %s2887_s7, 4  ;;  %s2445_s12 = smov [#allocation9]   ;;  %s459_s19 = int_to_ptr.hbm [resolvable:$true] %s458_s19 }
  0x1d   : > { %s438_s30 = sshll.u32 %s2889_s4, 4  ;;  %s440_s25 = sshll.u32 %s2445_s12, 4  ;;  %s439_s30 = int_to_ptr.hbm [resolvable:$true] %s438_s30  ;;  %s441_s25 = int_to_ptr.vmem [resolvable:$true] %s440_s25 }
  0x1e   : > { %2078 = dma.hbm_to_vmem [thread:$0]  (!%p2575_p6), %s419_s27, 10240, %s421_s0, [#allocation8], %s2443_s15, %s2443_s15, %s2444_s14  }
  0x1f   : > { %2084 = dma.hbm_to_vmem [thread:$0]  (!%p2575_p6), %s459_s19, 10240, %s461_s16, [#allocation11], %s2443_s15, %s2443_s15, %s2444_s14  }
  0x20   : > { %s478_s7 = sshll.u32 %s2890_s10, 4  ;;  %s2446_s1 = smov [#allocation12]   ;;  %s479_s7 = int_to_ptr.hbm [resolvable:$true] %s478_s7 }
  0x21   : > { %2081 = dma.hbm_to_vmem [thread:$0]  (!%p2575_p6), %s439_s30, 10240, %s441_s25, [#allocation8], %s2443_s15, %s2443_s15, %s2444_s14  }
  0x22   : > { %s480_s16 = sshll.u32 %s2446_s1, 4  ;;  %s2891_s13 = sld [smem:[#allocation28_spill]]  ;;  %s481_s16 = int_to_ptr.vmem [resolvable:$true] %s480_s16 }
  0x23   : > { %2087 = dma.hbm_to_vmem [thread:$0]  (!%p2575_p6), %s479_s7, 10240, %s481_s16, [#allocation11], %s2443_s15, %s2443_s15, %s2444_s14  }
  0x24   : > { %s2447_s12 = smov [#allocation13]   ;;  %s2011_s30 = sadd.s32 4294967294, %s2439_s24  }
  0x25   : > { %s500_s26 = sshll.u32 %s2447_s12, 4  ;;  %s2600_s17 = sadd.s32 1, %s2439_s24   ;;  %s501_s26 = int_to_ptr.vmem [resolvable:$true] %s500_s26 }
  0x26   : > { %s42_s18 = sadd.s32 1, %s2435_s23  ;;  %s39_s25 = ssub.s32 %s2439_s24, %s2600_s17 }
  0x27   : > { %p49_p7 = scmp.ne.s32.totalorder %s2435_s23, %s2431_s22  ;;  %p40_p8 = scmp.eq.s32.totalorder %s39_s25, 0 }
  0x28   : > { %s498_s19 = sshll.u32 %s2891_s13, 4  ;;  %p50_p9 = scmp.eq.s32.totalorder %s2439_s24, 0  ;;  %s499_s19 = int_to_ptr.hbm [resolvable:$true] %s498_s19 }
  0x29   : > { %2090 = dma.hbm_to_vmem [thread:$0]  (!%p2575_p6), %s499_s19, 10240, %s501_s26, [#allocation14], %s2443_s15, %s2443_s15, %s2444_s14  }
  0x2a   : > { %p55_p10 = scmp.ne.s32.totalorder %s2431_s22, %s2427_s21  ;;  %p394_p11 = scmp.eq.s32.totalorder %s2558_s28, 1 }
  0x2b   : > { %s2612_s7 = scalar_select %p40_p8, %s2435_s23, %s42_s18  }
  0x2c   : > { %p2616_p12 = por %p56_p1, %p55_p10  ;;  %p2620_p13 = por %p394_p11, %p49_p7 }
  0x2d   : > { %2892 = sst [smem:[#allocation21_spill]] %s2612_s7  ;;  %p400_p0 = scmp.eq.s32.totalorder %s2011_s30, 1 }
  0x2e   : > { %p51_p2 = por %p50_p9, %p49_p7  ;;  %s520_s15 = sand.u32 1, %s2435_s23  }
  0x2f   : > { %p2625_p4 = por %p400_p0, %p55_p10  ;;  %p2104_p6 = scmp.lt.s32.totalorder %s2439_s24, 2 }
  0x30   : > { %s2019_s16 = sshll.u32 %s520_s15, 3  ;;  %s2020_s27 = sshll.u32 %s2439_s24, 3 }
  0x31   : > { %s2896_s12 = sld [smem:[#allocation22_spill]]  ;;  %s524_s25 = scalar_lea.vmem [#allocation4], %s2019_s16 }
  0x32   : > { %s532_s4 = sshll.u32 %s524_s25, 4  ;;  %p2634_p8 = pnand %p2104_p6, %p51_p2  ;;  %s533_s4 = int_to_ptr.vmem [resolvable:$true] %s532_s4 }
  0x33   : > { %s521_s10 = scalar_lea.sflag [#allocation5], %s520_s15 }
  0x34   : > { %p2335_p9 = pneg %p2634_p8 }
  0x37   : > { %s528_s26 = scalar_lea.hbm %s2896_s12, %s2020_s27  ;;  %s2338_s16 = scalar_lea.hbm %s2896_s12, 16 }
  0x38   : > { %s530_s18 = sshll.u32 %s528_s26, 4  ;;  %s531_s18 = int_to_ptr.hbm [resolvable:$true] %s530_s18 }
  0x39   : > { %s2331_s13 = sshra.s32 %s531_s18, 4  ;;  %s2332_s13 = int_to_ptr.hbm [resolvable:$true] %s2331_s13 }
  0x3a   : > { %s2333_s7 = scalar_lea.hbm %s2332_s13, 8  ;;  %p2339_p0 = scmp.lt.s32.totalorder %s2332_s13, %s2896_s12 }
  0x3b   : > { %p2334_p7 = scmp.ne.s32.totalorder %s2332_s13, %s2333_s7  ;;  %p2340_p2 = scmp.lt.s32.totalorder %s2338_s16, %s2333_s7 }
  0x3d   : > { %p2336_p10 = pnand %p2335_p9, %p2334_p7  ;;  %p2341_p6 = por %p2340_p2, %p2339_p0 }
  0x3f   : > { %p2337_p11 = pneg %p2336_p10 }
  0x41   : > { %p2342_p5 = pnand %p2341_p6, %p2337_p11 }
  0x43   : > { %2345 = shalt.err (!%p2342_p5)
}
  0x44   : > { %2094 = dma.hbm_to_vmem [thread:$0]  (!%p2634_p8), %s531_s18, 128, %s533_s4, %s521_s10  }
  0x45   : > { %541 = sbr.rel (%p2563_p3) target bundleno = 1220 (0x4c4), region = 84  ;;  %s2651_s15 = sand.u32 (!%p2563_p3), 1, %s2431_s22  }
  0x46   : > { %s2022_s25 = sshll.u32 (!%p2563_p3), %s2651_s15, 3  ;;  %s544_s27 = scalar_lea.sflag (!%p2563_p3), [#allocation5], %s2651_s15 }
  0x47   : > { %s547_s13 = scalar_lea.vmem (!%p2563_p3), [#allocation4], %s2022_s25 }
  0x4a   : > { %2406 = dma.done.wait (%p2616_p12), %s544_s27, 128  }
  0x4b   : > { %2408 = vsyncadd (%p2616_p12), %s544_s27, 4294967168 }
  0x4c   : > { %2410 = dma.done.wait (%p56_p1), [#allocation8], 20480  }
  0x4d   : > { %2412 = vsyncadd (%p56_p1), [#allocation8], 4294946816 }
  0x4e   : > { %2414 = dma.done.wait (%p56_p1), [#allocation11], 20480  }
  0x4f   : > { %2416 = vsyncadd (%p56_p1), [#allocation11], 4294946816 }
  0x50   : > { %2418 = dma.done.wait (%p56_p1), [#allocation14], 10240  }
  0x51   : > { %2420 = vsyncadd (%p56_p1), [#allocation14], 4294957056  ;;  %v626_v0 = vld [vmem:[%s547_s13] sm:$0xff]  ;;  %v707_v3 = vld [vmem:[#allocation7 + $0x68] sm:$0xff]  ;;  %vm659_vm0 = vcmask 64512   ;;  %s2898_s7 = sld [smem:[#allocation27_spill]] }
  0x52   : > { %v709_v1 = vld [vmem:[#allocation7 + $0x78] sm:$0xff]  ;;  %v708_v2 = vld [vmem:[#allocation7 + $0x70] sm:$0xff]  ;;  %627 = vxpose.xlu0.b32.start.end [1/1] (short) (narrow) %v626_v0, 16  ;;  %v706_v7 = vld [vmem:[#allocation7 + $0x60] sm:$0xff]  ;;  %s2899_s30 = sld [smem:[#allocation29_spill]]  ;;  %s2030_s26 = sshll.u32 %s2558_s28, 3 }
  0x53   : > { %774 = vmatpush.msra.mxu0 %v709_v1  ;;  %v741_v4 = vld [vmem:[#allocation7 + $0x178] sm:$0xff]  ;;  %v740_v5 = vld [vmem:[#allocation7 + $0x170] sm:$0xff]  ;;  %v739_v8 = vld [vmem:[#allocation7 + $0x168] sm:$0xff]  ;;  %s2900_s19 = sld [smem:[#allocation30_spill]]  ;;  %s621_s29 = scalar_lea.vmem [#allocation15], %s2022_s25  ;;  %vm1875_vm5 = vcmask 130048  }
  0x54   : > { %820 = vmatpush.msra.mxu2 %v741_v4  ;;  %v725_v6 = vld [vmem:[#allocation7 + $0xf8] sm:$0xff]  ;;  %v724_v9 = vld [vmem:[#allocation7 + $0xf0] sm:$0xff]  ;;  %v723_v10 = vld [vmem:[#allocation7 + $0xe8] sm:$0xff]  ;;  %s2901_s4 = sld [smem:[#allocation31_spill]]  ;;  %s1878_s18 = scalar_lea.sflag [#allocation6], %s2651_s15 }
  0x55   : > { %775 = vmatpush.msra.mxu0 %v708_v2  ;;  %797 = vmatpush.msra.mxu1 %v725_v6  ;;  %v705_v11 = vld [vmem:[#allocation7 + $0x58] sm:$0xff]  ;;  %v738_v12 = vld [vmem:[#allocation7 + $0x160] sm:$0xff]  ;;  %v704_v14 = vld [vmem:[#allocation7 + $0x50] sm:$0xff] }
  0x56   : > { %821 = vmatpush.msra.mxu2 %v740_v5  ;;  %v722_v13 = vld [vmem:[#allocation7 + $0xe0] sm:$0xff]  ;;  %v737_v15 = vld [vmem:[#allocation7 + $0x158] sm:$0xff]  ;;  %v756_v18 = vld [vmem:[#allocation7 + $0x1f0] sm:$0xff] }
  0x57   : > { %776 = vmatpush.msra.mxu0 %v707_v3  ;;  %798 = vmatpush.msra.mxu1 %v724_v9  ;;  %v757_v16 = vld [vmem:[#allocation7 + $0x1f8] sm:$0xff]  ;;  %v703_v19 = vld [vmem:[#allocation7 + $0x48] sm:$0xff]  ;;  %v736_v20 = vld [vmem:[#allocation7 + $0x150] sm:$0xff] }
  0x58   : > { %822 = vmatpush.msra.mxu2 %v739_v8  ;;  %v721_v17 = vld [vmem:[#allocation7 + $0xd8] sm:$0xff]  ;;  %843 = vmatpush.msra.mxu3 %v757_v16  ;;  %v720_v21 = vld [vmem:[#allocation7 + $0xd0] sm:$0xff]  ;;  %v755_v22 = vld [vmem:[#allocation7 + $0x1e8] sm:$0xff] }
  0x59   : > { %777 = vmatpush.msra.mxu0 %v706_v7  ;;  %799 = vmatpush.msra.mxu1 %v723_v10  ;;  %v702_v23 = vld [vmem:[#allocation7 + $0x40] sm:$0xff]  ;;  %v735_v24 = vld [vmem:[#allocation7 + $0x148] sm:$0xff]  ;;  %v701_v27 = vld [vmem:[#allocation7 + $0x38] sm:$0xff] }
  0x5a   : > { %823 = vmatpush.msra.mxu2 %v738_v12  ;;  %844 = vmatpush.msra.mxu3 %v756_v18  ;;  %v719_v25 = vld [vmem:[#allocation7 + $0xc8] sm:$0xff]  ;;  %v754_v26 = vld [vmem:[#allocation7 + $0x1e0] sm:$0xff]  ;;  %v753_v30 = vld [vmem:[#allocation7 + $0x1d8] sm:$0xff]  ;;  %s1888_s10 = scalar_lea.hbm %s2901_s4, %s2030_s26 }
  0x5b   : > { %778 = vmatpush.msra.mxu0 %v705_v11  ;;  %800 = vmatpush.msra.mxu1 %v722_v13  ;;  %v734_v28 = vld [vmem:[#allocation7 + $0x140] sm:$0xff]  ;;  %v700_v31 = vld [vmem:[#allocation7 + $0x30] sm:$0xff]  ;;  %v733_v32 = vld [vmem:[#allocation7 + $0x138] sm:$0xff]  ;;  %s1892_s20 = sshll.u32 %s1888_s10, 4  ;;  %s1893_s20 = int_to_ptr.hbm [resolvable:$true] %s1892_s20 }
  0x5c   : > { %824 = vmatpush.msra.mxu2 %v737_v15  ;;  %845 = vmatpush.msra.mxu3 %v755_v22  ;;  %v718_v29 = vld [vmem:[#allocation7 + $0xc0] sm:$0xff]  ;;  %v717_v33 = vld [vmem:[#allocation7 + $0xb8] sm:$0xff]  ;;  %v752_v34 = vld [vmem:[#allocation7 + $0x1d0] sm:$0xff] }
  0x5d   : > { %779 = vmatpush.msra.mxu0 %v704_v14  ;;  %801 = vmatpush.msra.mxu1 %v721_v17  ;;  %v699_v35 = vld [vmem:[#allocation7 + $0x28] sm:$0xff]  ;;  %v698_v36 = vld [vmem:[#allocation7 + $0x20] sm:$0xff]  ;;  %v732_v37 = vld [vmem:[#allocation7 + $0x130] sm:$0xff]  ;;  %v671_v17 = vlaneseq }
  0x5e   : > { %825 = vmatpush.msra.mxu2 %v736_v20  ;;  %846 = vmatpush.msra.mxu3 %v754_v26  ;;  %v731_v38 = vld [vmem:[#allocation7 + $0x128] sm:$0xff]  ;;  %v716_v39 = vld [vmem:[#allocation7 + $0xb0] sm:$0xff]  ;;  %v697_v41 = vld [vmem:[#allocation7 + $0x18] sm:$0xff] }
  0x5f   : > { %780 = vmatpush.msra.mxu0 %v703_v19  ;;  %802 = vmatpush.msra.mxu1 %v720_v21  ;;  %v751_v40 = vld [vmem:[#allocation7 + $0x1c8] sm:$0xff]  ;;  %v730_v42 = vld [vmem:[#allocation7 + $0x120] sm:$0xff]  ;;  %v749_v46 = vld [vmem:[#allocation7 + $0x1b8] sm:$0xff]  ;;  %v2673_v18 = vshrl.u32 %v671_v17, 7 }
  0x60   : > { %826 = vmatpush.msra.mxu2 %v735_v24  ;;  %847 = vmatpush.msra.mxu3 %v753_v30  ;;  %v715_v43 = vld [vmem:[#allocation7 + $0xa8] sm:$0xff]  ;;  %v750_v44 = vld [vmem:[#allocation7 + $0x1c0] sm:$0xff]  ;;  %v696_v47 = vld [vmem:[#allocation7 + $0x10] sm:$0xff]  ;;  %v2448_v24 = vmov 0.0  }
  0x61   : > { %781 = vmatpush.msra.mxu0 %v702_v23  ;;  %803 = vmatpush.msra.mxu1 %v719_v25  ;;  %v714_v45 = vld [vmem:[#allocation7 + $0xa0] sm:$0xff]  ;;  %v729_v48 = vld [vmem:[#allocation7 + $0x118] sm:$0xff]  ;;  %v748_v50 = vld [vmem:[#allocation7 + $0x1b0] sm:$0xff]  ;;  %v2675_v25 = vrot.slane %v2448_v24, 6  ;;  %v2677_v26 = vrot.slane %v2448_v24, 7  ;;  %vm673_vm1 = vcmp.lt.s32.totalorder %v2673_v18, 2 }
  0x62   : > { %827 = vmatpush.msra.mxu2 %v734_v28  ;;  %848 = vmatpush.msra.mxu3 %v752_v34  ;;  %v713_v49 = vld [vmem:[#allocation7 + $0x98] sm:$0xff]  ;;  %v695_v51 = vld [vmem:[#allocation7 + $0x8] sm:$0xff]  ;;  %v728_v52 = vld [vmem:[#allocation7 + $0x110] sm:$0xff]  ;;  %vm679_vm2 = vcmp.lt.s32.totalorder %v2673_v18, 1  ;;  %vm685_vm3 = vcmp.lt.s32.totalorder %v2673_v18, 7  ;;  %vm691_vm4 = vcmp.lt.s32.totalorder %v2673_v18, 6 }
  0x63   : > { %782 = vmatpush.msra.mxu0 %v701_v27  ;;  %804 = vmatpush.msra.mxu1 %v718_v29  ;;  %v712_v53 = vld [vmem:[#allocation7 + $0x90] sm:$0xff]  ;;  %v694_v54 = vld [vmem:[#allocation7] sm:$0xff]  ;;  %v727_v55 = vld [vmem:[#allocation7 + $0x108] sm:$0xff] }
  0x64   : > { %828 = vmatpush.msra.mxu2 %v733_v32  ;;  %849 = vmatpush.msra.mxu3 %v751_v40  ;;  %v773_v56 = vld [vmem:[#allocation7 + $0x278] sm:$0xff]  ;;  %v726_v57 = vld [vmem:[#allocation7 + $0x100] sm:$0xff]  ;;  %v772_v58 = vld [vmem:[#allocation7 + $0x270] sm:$0xff] }
  0x65   : > { %783 = vmatpush.msra.mxu0 %v700_v31  ;;  %805 = vmatpush.msra.mxu1 %v717_v33  ;;  %v771_v59 = vld [vmem:[#allocation7 + $0x268] sm:$0xff]  ;;  %v770_v60 = vld [vmem:[#allocation7 + $0x260] sm:$0xff]  ;;  %v769_v61 = vld [vmem:[#allocation7 + $0x258] sm:$0xff] }
  0x66   : > { %829 = vmatpush.msra.mxu2 %v732_v37  ;;  %850 = vmatpush.msra.mxu3 %v750_v44  ;;  %v768_v62 = vld [vmem:[#allocation7 + $0x250] sm:$0xff]  ;;  %v711_v63 = vld [vmem:[#allocation7 + $0x88] sm:$0xff]  ;;  %v710_v2 = vld [vmem:[#allocation7 + $0x80] sm:$0xff] }
  0x67   : > { %784 = vmatpush.msra.mxu0 %v699_v35  ;;  %806 = vmatpush.msra.mxu1 %v716_v39  ;;  %v747_v0 = vld [vmem:[#allocation7 + $0x1a8] sm:$0xff]  ;;  %v746_v3 = vld [vmem:[#allocation7 + $0x1a0] sm:$0xff]  ;;  %v745_v5 = vld [vmem:[#allocation7 + $0x198] sm:$0xff] }
  0x68   : > { %830 = vmatpush.msra.mxu2 %v731_v38  ;;  %851 = vmatpush.msra.mxu3 %v749_v46  ;;  %v767_v1 = vld [vmem:[#allocation7 + $0x248] sm:$0xff]  ;;  %v766_v4 = vld [vmem:[#allocation7 + $0x240] sm:$0xff]  ;;  %v765_v6 = vld [vmem:[#allocation7 + $0x238] sm:$0xff]  ;;  %v2698_v46 = vrot.slane %v2448_v24, 1 }
  0x69   : > { %785 = vmatpush.msra.mxu0 %v698_v36  ;;  %807 = vmatpush.msra.mxu1 %v715_v43  ;;  %v744_v7 = vld [vmem:[#allocation7 + $0x190] sm:$0xff]  ;;  %v743_v9 = vld [vmem:[#allocation7 + $0x188] sm:$0xff]  ;;  %v742_v11 = vld [vmem:[#allocation7 + $0x180] sm:$0xff] }
  0x6a   : > { %831 = vmatpush.msra.mxu2 %v730_v42  ;;  %852 = vmatpush.msra.mxu3 %v748_v50  ;;  %v764_v8 = vld [vmem:[#allocation7 + $0x230] sm:$0xff]  ;;  %v763_v10 = vld [vmem:[#allocation7 + $0x228] sm:$0xff]  ;;  %v762_v12 = vld [vmem:[#allocation7 + $0x220] sm:$0xff]  ;;  %v2706_v50 = vrot.slane %v2448_v24, 2 }
  0x6b   : > { %786 = vmatpush.msra.mxu0 %v697_v41  ;;  %808 = vmatpush.msra.mxu1 %v714_v45  ;;  %v761_v13 = vld [vmem:[#allocation7 + $0x218] sm:$0xff]  ;;  %v760_v14 = vld [vmem:[#allocation7 + $0x210] sm:$0xff]  ;;  %v759_v15 = vld [vmem:[#allocation7 + $0x208] sm:$0xff] }
  0x6c   : > { %832 = vmatpush.msra.mxu2 %v729_v48  ;;  %853 = vmatpush.msra.mxu3 %v747_v0  ;;  %v758_v16 = vld [vmem:[#allocation7 + $0x200] sm:$0xff]  ;;  %v944_v19 = vld [vmem:[#allocation9 + $0x78] sm:$0xff]  ;;  %v943_v20 = vld [vmem:[#allocation9 + $0x70] sm:$0xff] }
  0x6d   : > { %787 = vmatpush.msra.mxu0 %v696_v47  ;;  %809 = vmatpush.msra.mxu1 %v713_v49  ;;  %v942_v21 = vld [vmem:[#allocation9 + $0x68] sm:$0xff]  ;;  %v976_v22 = vld [vmem:[#allocation9 + $0x178] sm:$0xff]  ;;  %v941_v28 = vld [vmem:[#allocation9 + $0x60] sm:$0xff] }
  0x6e   : > { %833 = vmatpush.msra.mxu2 %v728_v52  ;;  %854 = vmatpush.msra.mxu3 %v746_v3  ;;  %v940_v31 = vld [vmem:[#allocation9 + $0x58] sm:$0xff]  ;;  %v939_v34 = vld [vmem:[#allocation9 + $0x50] sm:$0xff]  ;;  %v938_v35 = vld [vmem:[#allocation9 + $0x48] sm:$0xff] }
  0x6f   : > { %788 = vmatpush.msra.mxu0 %v695_v51  ;;  %810 = vmatpush.msra.mxu1 %v712_v53  ;;  %v937_v52 = vld [vmem:[#allocation9 + $0x40] sm:$0xff]  ;;  %v975_v53 = vld [vmem:[#allocation9 + $0x170] sm:$0xff]  ;;  %v992_v3 = vld [vmem:[#allocation9 + $0x1f8] sm:$0xff] }
  0x70   : > { %834 = vmatpush.msra.mxu2 %v727_v55  ;;  %855 = vmatpush.msra.mxu3 %v745_v5  ;;  %v936_v55 = vld [vmem:[#allocation9 + $0x38] sm:$0xff]  ;;  %v933_v0 = vld [vmem:[#allocation9 + $0x20] sm:$0xff]  ;;  %v970_v5 = vld [vmem:[#allocation9 + $0x148] sm:$0xff] }
  0x71   : > { %789 = vmatpush.msra.mxu0 %v694_v54  ;;  %811 = vmatpush.msra.mxu1 %v711_v63  ;;  %v960_v54 = vld [vmem:[#allocation9 + $0xf8] sm:$0xff]  ;;  %v957_v63 = vld [vmem:[#allocation9 + $0xe0] sm:$0xff]  ;;  %v967_v17 = vld [vmem:[#allocation9 + $0x130] sm:$0xff] }
  0x72   : > { %835 = vmatpush.msra.mxu2 %v726_v57  ;;  %856 = vmatpush.msra.mxu3 %v744_v7  ;;  %v959_v57 = vld [vmem:[#allocation9 + $0xf0] sm:$0xff] }
  0x73   : > { %866 = vmatpush.msrb.mxu0 %v773_v56  ;;  %812 = vmatpush.msra.mxu1 %v710_v2  ;;  %v974_v56 = vld [vmem:[#allocation9 + $0x168] sm:$0xff]  ;;  %v956_v2 = vld [vmem:[#allocation9 + $0xd8] sm:$0xff]  ;;  %v991_v7 = vld [vmem:[#allocation9 + $0x1f0] sm:$0xff] }
  0x74   : > { %857 = vmatpush.msra.mxu3 %v743_v9  ;;  %1032 = vmatpush.msrb.mxu2 %v960_v54  ;;  %v969_v9 = vld [vmem:[#allocation9 + $0x140] sm:$0xff]  ;;  %v987_v24 = vld [vmem:[#allocation9 + $0x1d0] sm:$0xff]  ;;  %v980_v54 = vld [vmem:[#allocation9 + $0x198] sm:$0xff] }
  0x75   : > { %867 = vmatpush.msrb.mxu0 %v772_v58  ;;  %1009 = vmatpush.msrb.mxu1 %v944_v19  ;;  %v935_v58 = vld [vmem:[#allocation9 + $0x30] sm:$0xff]  ;;  %v952_v19 = vld [vmem:[#allocation9 + $0xb8] sm:$0xff] }
  0x76   : > { %858 = vmatpush.msra.mxu3 %v742_v11  ;;  %1033 = vmatpush.msrb.mxu2 %v959_v57  ;;  %v990_v11 = vld [vmem:[#allocation9 + $0x1e8] sm:$0xff]  ;;  %v999_v57 = vld [vmem:[#allocation9 + $0x230] sm:$0xff] }
  0x77   : > { %868 = vmatpush.msrb.mxu0 %v771_v59  ;;  %1010 = vmatpush.msrb.mxu1 %v943_v20  ;;  %v973_v59 = vld [vmem:[#allocation9 + $0x160] sm:$0xff]  ;;  %v988_v20 = vld [vmem:[#allocation9 + $0x1d8] sm:$0xff] }
  0x78   : > { %1055 = vmatpush.msrb.mxu3 %v976_v22  ;;  %v966_v22 = vld [vmem:[#allocation9 + $0x128] sm:$0xff] }
  0x79   : > { %869 = vmatpush.msrb.mxu0 %v770_v60  ;;  %1011 = vmatpush.msrb.mxu1 %v942_v21  ;;  %v958_v60 = vld [vmem:[#allocation9 + $0xe8] sm:$0xff]  ;;  %v1008_v21 = vld [vmem:[#allocation9 + $0x278] sm:$0xff] }
  0x7a   : > { %1056 = vmatpush.msrb.mxu3 %v975_v53  ;;  %1034 = vmatpush.msrb.mxu2 %v958_v60  ;;  %v1001_v53 = vld [vmem:[#allocation9 + $0x240] sm:$0xff]  ;;  %v998_v60 = vld [vmem:[#allocation9 + $0x228] sm:$0xff] }
  0x7b   : > { %870 = vmatpush.msrb.mxu0 %v769_v61  ;;  %1012 = vmatpush.msrb.mxu1 %v941_v28  ;;  %v934_v61 = vld [vmem:[#allocation9 + $0x28] sm:$0xff]  ;;  %v965_v28 = vld [vmem:[#allocation9 + $0x120] sm:$0xff] }
  0x7c   : > { %1057 = vmatpush.msrb.mxu3 %v974_v56  ;;  %1035 = vmatpush.msrb.mxu2 %v957_v63  ;;  %v979_v56 = vld [vmem:[#allocation9 + $0x190] sm:$0xff] }
  0x7d   : > { %871 = vmatpush.msrb.mxu0 %v768_v62  ;;  %1013 = vmatpush.msrb.mxu1 %v940_v31  ;;  %v972_v62 = vld [vmem:[#allocation9 + $0x158] sm:$0xff]  ;;  %v1006_v31 = vld [vmem:[#allocation9 + $0x268] sm:$0xff] }
  0x7e   : > { %1058 = vmatpush.msrb.mxu3 %v973_v59  ;;  %1036 = vmatpush.msrb.mxu2 %v956_v2  ;;  %v978_v59 = vld [vmem:[#allocation9 + $0x188] sm:$0xff]  ;;  %v996_v2 = vld [vmem:[#allocation9 + $0x218] sm:$0xff] }
  0x7f   : > { %872 = vmatpush.msrb.mxu0 %v767_v1  ;;  %1014 = vmatpush.msrb.mxu1 %v939_v34  ;;  %v971_v1 = vld [vmem:[#allocation9 + $0x150] sm:$0xff]  ;;  %v985_v34 = vld [vmem:[#allocation9 + $0x1c0] sm:$0xff] }
  0x80   : > { %1059 = vmatpush.msrb.mxu3 %v972_v62  ;;  %v997_v62 = vld [vmem:[#allocation9 + $0x220] sm:$0xff] }
  0x81   : > { %873 = vmatpush.msrb.mxu0 %v766_v4  ;;  %1015 = vmatpush.msrb.mxu1 %v938_v35  ;;  %v932_v4 = vld [vmem:[#allocation9 + $0x18] sm:$0xff]  ;;  %v1005_v35 = vld [vmem:[#allocation9 + $0x260] sm:$0xff] }
  0x82   : > { %1060 = vmatpush.msrb.mxu3 %v971_v1 }
  0x83   : > { %874 = vmatpush.msrb.mxu0 %v765_v6  ;;  %1016 = vmatpush.msrb.mxu1 %v937_v52  ;;  %v955_v6 = vld [vmem:[#allocation9 + $0xd0] sm:$0xff]  ;;  %v981_v52 = vld [vmem:[#allocation9 + $0x1a0] sm:$0xff] }
  0x84   : > { %1061 = vmatpush.msrb.mxu3 %v970_v5  ;;  %1037 = vmatpush.msrb.mxu2 %v955_v6 }
  0x85   : > { %875 = vmatpush.msrb.mxu0 %v764_v8  ;;  %1017 = vmatpush.msrb.mxu1 %v936_v55  ;;  %v931_v8 = vld [vmem:[#allocation9 + $0x10] sm:$0xff]  ;;  %v1000_v55 = vld [vmem:[#allocation9 + $0x238] sm:$0xff] }
  0x86   : > { %1062 = vmatpush.msrb.mxu3 %v969_v9 }
  0x87   : > { %876 = vmatpush.msrb.mxu0 %v763_v10  ;;  %1018 = vmatpush.msrb.mxu1 %v935_v58  ;;  %v954_v10 = vld [vmem:[#allocation9 + $0xc8] sm:$0xff] }
  0x88   : > { %1038 = vmatpush.msrb.mxu2 %v954_v10 }
  0x89   : > { %877 = vmatpush.msrb.mxu0 %v762_v12  ;;  %1019 = vmatpush.msrb.mxu1 %v934_v61  ;;  %v930_v12 = vld [vmem:[#allocation9 + $0x8] sm:$0xff]  ;;  %v977_v61 = vld [vmem:[#allocation9 + $0x180] sm:$0xff] }
  0x8b   : > { %878 = vmatpush.msrb.mxu0 %v761_v13  ;;  %1020 = vmatpush.msrb.mxu1 %v933_v0  ;;  %v968_v13 = vld [vmem:[#allocation9 + $0x138] sm:$0xff] }
  0x8c   : > { %1063 = vmatpush.msrb.mxu3 %v968_v13 }
  0x8d   : > { %879 = vmatpush.msrb.mxu0 %v760_v14  ;;  %1021 = vmatpush.msrb.mxu1 %v932_v4  ;;  %v953_v14 = vld [vmem:[#allocation9 + $0xc0] sm:$0xff]  ;;  %v994_v4 = vld [vmem:[#allocation9 + $0x208] sm:$0xff] }
  0x8e   : > { %1039 = vmatpush.msrb.mxu2 %v953_v14  ;;  %1064 = vmatpush.msrb.mxu3 %v967_v17  ;;  %v2152_v14 = vld [vmem:[%s2859_s3] ss:$0 sm:$0xff] }
  0x8f   : > { %880 = vmatpush.msrb.mxu0 %v759_v15  ;;  %1022 = vmatpush.msrb.mxu1 %v931_v8  ;;  %v989_v15 = vld [vmem:[#allocation9 + $0x1e0] sm:$0xff] }
  0x90   : > { %1040 = vmatpush.msrb.mxu2 %v952_v19  ;;  %1065 = vmatpush.msrb.mxu3 %v966_v22  ;;  %v993_v8 = vld [vmem:[#allocation9 + $0x200] sm:$0xff] }
  0x91   : > { %881 = vmatpush.msrb.mxu0 %v758_v16  ;;  %1023 = vmatpush.msrb.mxu1 %v930_v12  ;;  %v929_v16 = vld [vmem:[#allocation9] sm:$0xff] }
  0x92   : > { %1066 = vmatpush.msrb.mxu3 %v965_v28 }
  0x93   : > { %1024 = vmatpush.msrb.mxu1 %v929_v16 }
  0xf6   : > { %v643_v23 = vpop.trf.xlu0 }
  0xf7   : > { %v660_v27 = vsel %vm659_vm0, %v643_v23, 0.0  ;;  %2033 = vmatmul.msk.f32.vlgmr.msra.gmra.mxu2 %vm659_vm0, %v643_v23  ;;  %v951_v23 = vld [vmem:[#allocation9 + $0xb0] sm:$0xff] }
  0xf8   : > { %v669_v29 = vrot.slane %v660_v27, 6  ;;  %v677_v30 = vrot.slane %v660_v27, 7  ;;  %v682_v40 = vrot.slane %v660_v27, 1  ;;  %v688_v47 = vrot.slane %v660_v27, 2  ;;  %1041 = vmatpush.msrb.mxu2 %v951_v23  ;;  %v1007_v27 = vld [vmem:[#allocation9 + $0x270] sm:$0xff] }
  0xfa   : > { %v675_v32 = vsel %vm673_vm1, %v2675_v25, %v669_v29  ;;  %v681_v33 = vsel %vm679_vm2, %v2677_v26, %v677_v30 }
  0xfb   : > { %790 = vmatmul.f32.vlgmr.msra.gmra.mxu0 %v675_v32  ;;  %813 = vmatmul.f32.vlgmr.msra.gmra.mxu1 %v681_v33  ;;  %v964_v32 = vld [vmem:[#allocation9 + $0x118] sm:$0xff]  ;;  %v949_v33 = vld [vmem:[#allocation9 + $0xa0] sm:$0xff] }
  0xfc   : > { %1078 = vmatpush.msra.mxu0 %v992_v3  ;;  %1101 = vmatpush.msra.mxu1 %v1008_v21  ;;  %v995_v3 = vld [vmem:[#allocation9 + $0x210] sm:$0xff] }
  0xfd   : > { %1067 = vmatpush.msrb.mxu3 %v964_v32 }
  0xfe   : > { %v644_v36 = vpop.trf.xlu0  ;;  %1079 = vmatpush.msra.mxu0 %v991_v7  ;;  %1102 = vmatpush.msra.mxu1 %v1007_v27  ;;  %v1178_v27 = vld [vmem:[#allocation10 + $0x70] sm:$0xff] }
  0xff   : > { %v661_v37 = vsel %vm659_vm0, %v644_v36, 0.0  ;;  %2034 = vmatmul.msk.f32.gmra.mxu2 %vm659_vm0, %v644_v36  ;;  %v963_v36 = vld [vmem:[#allocation9 + $0x110] sm:$0xff] }
 0x100   : > { %v670_v38 = vrot.slane %v661_v37, 6  ;;  %v678_v39 = vrot.slane %v661_v37, 7  ;;  %v683_v41 = vrot.slane %v661_v37, 1  ;;  %v689_v45 = vrot.slane %v661_v37, 2  ;;  %1080 = vmatpush.msra.mxu0 %v990_v11  ;;  %1103 = vmatpush.msra.mxu1 %v1006_v31  ;;  %v948_v37 = vld [vmem:[#allocation9 + $0x98] sm:$0xff] }
 0x101   : > { %1068 = vmatpush.msrb.mxu3 %v963_v36  ;;  %v2151_v11 = vld [vmem:[%s2858_s2] ss:$0 sm:$0xff]  ;;  %v1175_v36 = vld [vmem:[#allocation10 + $0x58] sm:$0xff] }
 0x102   : > { %v674_v42 = vsel %vm673_vm1, %v669_v29, %v670_v38  ;;  %v680_v43 = vsel %vm679_vm2, %v677_v30, %v678_v39  ;;  %v687_v44 = vsel %vm685_vm3, %v682_v40, %v683_v41  ;;  %v693_v48 = vsel %vm691_vm4, %v688_v47, %v689_v45  ;;  %1081 = vmatpush.msra.mxu0 %v989_v15  ;;  %v950_v29 = vld [vmem:[#allocation9 + $0xa8] sm:$0xff]  ;;  %v984_v38 = vld [vmem:[#allocation9 + $0x1b8] sm:$0xff] }
 0x103   : > { %793 = vmatmul.f32.gmra.mxu0 %v674_v42  ;;  %816 = vmatmul.f32.gmra.mxu1 %v680_v43  ;;  %v686_v49 = vsel %vm685_vm3, %v683_v41, %v2698_v46  ;;  %v692_v51 = vsel %vm691_vm4, %v689_v45, %v2706_v50  ;;  %v986_v30 = vld [vmem:[#allocation9 + $0x1c8] sm:$0xff]  ;;  %v1004_v39 = vld [vmem:[#allocation9 + $0x258] sm:$0xff]  ;;  %v947_v41 = vld [vmem:[#allocation9 + $0x90] sm:$0xff] }
 0x104   : > { %859 = vmatmul.f32.vlgmr.msra.gmra.mxu3 %v687_v44  ;;  %1082 = vmatpush.msra.mxu0 %v988_v20  ;;  %v962_v40 = vld [vmem:[#allocation9 + $0x108] sm:$0xff]  ;;  %v983_v42 = vld [vmem:[#allocation9 + $0x1b0] sm:$0xff]  ;;  %v961_v44 = vld [vmem:[#allocation9 + $0x100] sm:$0xff] }
 0x105   : > { %1042 = vmatpush.msrb.mxu2 %v950_v29  ;;  %1104 = vmatpush.msra.mxu1 %v1005_v35  ;;  %v1003_v43 = vld [vmem:[#allocation9 + $0x250] sm:$0xff]  ;;  %v946_v45 = vld [vmem:[#allocation9 + $0x88] sm:$0xff] }
 0x106   : > { %1083 = vmatpush.msra.mxu0 %v987_v24  ;;  %1069 = vmatpush.msrb.mxu3 %v962_v40  ;;  %v982_v47 = vld [vmem:[#allocation9 + $0x1a8] sm:$0xff]  ;;  %v1179_v24 = vld [vmem:[#allocation10 + $0x78] sm:$0xff] }
 0x107   : > { %1043 = vmatpush.msrb.mxu2 %v949_v33  ;;  %1105 = vmatpush.msra.mxu1 %v1004_v39  ;;  %v1177_v29 = vld [vmem:[#allocation10 + $0x68] sm:$0xff]  ;;  %v1176_v33 = vld [vmem:[#allocation10 + $0x60] sm:$0xff]  ;;  %v1174_v39 = vld [vmem:[#allocation10 + $0x50] sm:$0xff] }
 0x108   : > { %1084 = vmatpush.msra.mxu0 %v986_v30  ;;  %1070 = vmatpush.msrb.mxu3 %v961_v44  ;;  %v1211_v30 = vld [vmem:[#allocation10 + $0x178] sm:$0xff]  ;;  %v1173_v40 = vld [vmem:[#allocation10 + $0x48] sm:$0xff] }
 0x109   : > { %1044 = vmatpush.msrb.mxu2 %v948_v37  ;;  %1106 = vmatpush.msra.mxu1 %v1003_v43 }
 0x10a   : > { %1085 = vmatpush.msra.mxu0 %v985_v34 }
 0x10b   : > { %882 = vmatmul.f32.vlgmr.msrb.gmra.mxu0 %v693_v48  ;;  %1045 = vmatpush.msrb.mxu2 %v947_v41  ;;  %v1002_v48 = vld [vmem:[#allocation9 + $0x248] sm:$0xff] }
 0x10c   : > { %862 = vmatmul.f32.gmra.mxu3 %v686_v49  ;;  %1086 = vmatpush.msra.mxu0 %v984_v38 }
 0x10d   : > { %1046 = vmatpush.msrb.mxu2 %v946_v45  ;;  %1107 = vmatpush.msra.mxu1 %v1002_v48 }
 0x10e   : > { %1087 = vmatpush.msra.mxu0 %v983_v42 }
 0x10f   : > { %1108 = vmatpush.msra.mxu1 %v1001_v53 }
 0x110   : > { %1088 = vmatpush.msra.mxu0 %v982_v47 }
 0x111   : > { %1109 = vmatpush.msra.mxu1 %v1000_v55 }
 0x112   : > { %1089 = vmatpush.msra.mxu0 %v981_v52 }
 0x113   : > { %885 = vmatmul.f32.gmra.mxu0 %v692_v51  ;;  %v945_v51 = vld [vmem:[#allocation9 + $0x80] sm:$0xff]  ;;  %1110 = vmatpush.msra.mxu1 %v999_v57  ;;  %v1210_v57 = vld [vmem:[#allocation10 + $0x170] sm:$0xff] }
 0x114   : > { %1047 = vmatpush.msrb.mxu2 %v945_v51  ;;  %1090 = vmatpush.msra.mxu0 %v980_v54 }
 0x115   : > { %1111 = vmatpush.msra.mxu1 %v998_v60  ;;  %v1209_v60 = vld [vmem:[#allocation10 + $0x168] sm:$0xff] }
 0x116   : > { %1091 = vmatpush.msra.mxu0 %v979_v56  ;;  %1244 = vmatpush.msra.mxu2 %v1179_v24  ;;  %v1172_v56 = vld [vmem:[#allocation10 + $0x40] sm:$0xff]  ;;  %v1223_v24 = vld [vmem:[#allocation10 + $0x1d8] sm:$0xff] }
 0x117   : > { %1112 = vmatpush.msra.mxu1 %v997_v62  ;;  %v1170_v62 = vld [vmem:[#allocation10 + $0x30] sm:$0xff] }
 0x118   : > { %1092 = vmatpush.msra.mxu0 %v978_v59  ;;  %1245 = vmatpush.msra.mxu2 %v1178_v27  ;;  %v1171_v59 = vld [vmem:[#allocation10 + $0x38] sm:$0xff] }
 0x119   : > { %1113 = vmatpush.msra.mxu1 %v996_v2  ;;  %v1207_v2 = vld [vmem:[#allocation10 + $0x158] sm:$0xff] }
 0x11a   : > { %1093 = vmatpush.msra.mxu0 %v977_v61  ;;  %1246 = vmatpush.msra.mxu2 %v1177_v29  ;;  %v1194_v61 = vld [vmem:[#allocation10 + $0xf0] sm:$0xff]  ;;  %v1243_v27 = vld [vmem:[#allocation10 + $0x278] sm:$0xff] }
 0x11b   : > { %1114 = vmatpush.msra.mxu1 %v995_v3  ;;  %v1192_v3 = vld [vmem:[#allocation10 + $0xe0] sm:$0xff]  ;;  %v1186_v29 = vld [vmem:[#allocation10 + $0xb0] sm:$0xff] }
 0x11c   : > { %1290 = vmatpush.msrb.mxu0 %v1211_v30  ;;  %1247 = vmatpush.msra.mxu2 %v1176_v33  ;;  %v1222_v30 = vld [vmem:[#allocation10 + $0x1d0] sm:$0xff]  ;;  %v1185_v33 = vld [vmem:[#allocation10 + $0xa8] sm:$0xff] }
 0x11d   : > { %1115 = vmatpush.msra.mxu1 %v994_v4  ;;  %v1168_v4 = vld [vmem:[#allocation10 + $0x20] sm:$0xff] }
 0x11e   : > { %1248 = vmatpush.msra.mxu2 %v1175_v36  ;;  %1291 = vmatpush.msrb.mxu0 %v1210_v57  ;;  %v1199_v36 = vld [vmem:[#allocation10 + $0x118] sm:$0xff] }
 0x11f   : > { %1116 = vmatpush.msra.mxu1 %v993_v8  ;;  %v1167_v8 = vld [vmem:[#allocation10 + $0x18] sm:$0xff] }
 0x120   : > { %1249 = vmatpush.msra.mxu2 %v1174_v39  ;;  %1292 = vmatpush.msrb.mxu0 %v1209_v60  ;;  %v1240_v39 = vld [vmem:[#allocation10 + $0x260] sm:$0xff]  ;;  %v1214_v60 = vld [vmem:[#allocation10 + $0x190] sm:$0xff] }
 0x122   : > { %1250 = vmatpush.msra.mxu2 %v1173_v40  ;;  %v1198_v40 = vld [vmem:[#allocation10 + $0x110] sm:$0xff] }
 0x124   : > { %1251 = vmatpush.msra.mxu2 %v1172_v56  ;;  %v1236_v56 = vld [vmem:[#allocation10 + $0x240] sm:$0xff] }
 0x126   : > { %1252 = vmatpush.msra.mxu2 %v1171_v59  ;;  %v1235_v59 = vld [vmem:[#allocation10 + $0x238] sm:$0xff] }
 0x128   : > { %1253 = vmatpush.msra.mxu2 %v1170_v62 }
 0x178   : > { %v791_v49 = vpop.f32.mrf.mxu0  ;;  %v814_v58 = vpop.f32.mrf.mxu1 }
 0x179   : > { %v815_v1 = vadd.f32 %v814_v58, %v791_v49  ;;  %v1195_v58 = vld [vmem:[#allocation10 + $0xf8] sm:$0xff] }
 0x17a   : > { %v837_v0 = vpop.f32.mrf.mxu2  ;;  %1267 = vmatpush.msra.mxu3 %v1195_v58  ;;  %v1215_v58 = vld [vmem:[#allocation10 + $0x198] sm:$0xff] }
 0x17b   : > { %v838_v5 = vadd.f32 %v837_v0, %v815_v1  ;;  %v1193_v0 = vld [vmem:[#allocation10 + $0xe8] sm:$0xff] }
 0x17c   : > { %1268 = vmatpush.msra.mxu3 %v1194_v61  ;;  %v1169_v1 = vld [vmem:[#allocation10 + $0x28] sm:$0xff]  ;;  %v1234_v61 = vld [vmem:[#allocation10 + $0x230] sm:$0xff] }
 0x17d   : > { %1254 = vmatpush.msra.mxu2 %v1169_v1  ;;  %v1212_v1 = vld [vmem:[#allocation10 + $0x180] sm:$0xff] }
 0x17e   : > { %1269 = vmatpush.msra.mxu3 %v1193_v0  ;;  %v1233_v0 = vld [vmem:[#allocation10 + $0x228] sm:$0xff] }
 0x17f   : > { %1255 = vmatpush.msra.mxu2 %v1168_v4 }
 0x180   : > { %v794_v63 = vpop.f32.mrf.mxu0  ;;  %v817_v6 = vpop.f32.mrf.mxu1  ;;  %1270 = vmatpush.msra.mxu3 %v1192_v3  ;;  %v1232_v3 = vld [vmem:[#allocation10 + $0x220] sm:$0xff] }
 0x181   : > { %v818_v12 = vadd.f32 %v817_v6, %v794_v63  ;;  %v1208_v63 = vld [vmem:[#allocation10 + $0x160] sm:$0xff]  ;;  %v1191_v6 = vld [vmem:[#allocation10 + $0xd8] sm:$0xff]  ;;  %1256 = vmatpush.msra.mxu2 %v1167_v8  ;;  %v1230_v8 = vld [vmem:[#allocation10 + $0x210] sm:$0xff] }
 0x182   : > { %v840_v15 = vpop.f32.mrf.mxu2  ;;  %1293 = vmatpush.msrb.mxu0 %v1208_v63  ;;  %1271 = vmatpush.msra.mxu3 %v1191_v6  ;;  %v1213_v63 = vld [vmem:[#allocation10 + $0x188] sm:$0xff]  ;;  %v1231_v6 = vld [vmem:[#allocation10 + $0x218] sm:$0xff] }
 0x183   : > { %v841_v17 = vadd.f32 %v840_v15, %v818_v12  ;;  %v1166_v12 = vld [vmem:[#allocation10 + $0x10] sm:$0xff]  ;;  %v1225_v15 = vld [vmem:[#allocation10 + $0x1e8] sm:$0xff] }
 0x184   : > { %1294 = vmatpush.msrb.mxu0 %v1207_v2  ;;  %1257 = vmatpush.msra.mxu2 %v1166_v12 }
 0x187   : > { %v860_v7 = vpop.f32.mrf.mxu3 }
 0x188   : > { %v861_v9 = vadd.f32 %v860_v7, %v838_v5  ;;  %v883_v10 = vpop.f32.mrf.mxu0  ;;  %v1206_v5 = vld [vmem:[#allocation10 + $0x150] sm:$0xff]  ;;  %v1227_v7 = vld [vmem:[#allocation10 + $0x1f8] sm:$0xff] }
 0x189   : > { %1295 = vmatpush.msrb.mxu0 %v1206_v5 }
 0x18a   : > { %v884_v13 = vadd.f32 %v883_v10, %v861_v9  ;;  %v1205_v9 = vld [vmem:[#allocation10 + $0x148] sm:$0xff]  ;;  %v1190_v10 = vld [vmem:[#allocation10 + $0xd0] sm:$0xff] }
 0x18b   : > { %1296 = vmatpush.msrb.mxu0 %v1205_v9  ;;  %1272 = vmatpush.msra.mxu3 %v1190_v10  ;;  %v1229_v10 = vld [vmem:[#allocation10 + $0x208] sm:$0xff] }
 0x18c   : > { %v893_v16 = vmul.f32 %v2151_v11, %v884_v13  ;;  %v1204_v13 = vld [vmem:[#allocation10 + $0x140] sm:$0xff] }
 0x18d   : > { %1297 = vmatpush.msrb.mxu0 %v1204_v13 }
 0x18e   : > { %v899_v19 = vadd.f32 %v2152_v14, %v893_v16  ;;  %v1165_v16 = vld [vmem:[#allocation10 + $0x8] sm:$0xff] }
 0x18f   : > { %v863_v20 = vpop.f32.mrf.mxu3  ;;  %1258 = vmatpush.msra.mxu2 %v1165_v16 }
 0x190   : > { %2161 = vtanh.f32 %v899_v19  ;;  %v864_v21 = vadd.f32 %v863_v20, %v841_v17  ;;  %v886_v22 = vpop.f32.mrf.mxu0  ;;  %v1203_v17 = vld [vmem:[#allocation10 + $0x138] sm:$0xff]  ;;  %v1188_v19 = vld [vmem:[#allocation10 + $0xc0] sm:$0xff] }
 0x191   : > { %1298 = vmatpush.msrb.mxu0 %v1203_v17  ;;  %v1224_v20 = vld [vmem:[#allocation10 + $0x1e0] sm:$0xff] }
 0x192   : > { %v887_v23 = vadd.f32 %v886_v22, %v864_v21  ;;  %v1164_v21 = vld [vmem:[#allocation10] sm:$0xff]  ;;  %v1202_v22 = vld [vmem:[#allocation10 + $0x130] sm:$0xff] }
 0x193   : > { %1259 = vmatpush.msra.mxu2 %v1164_v21  ;;  %1299 = vmatpush.msrb.mxu0 %v1202_v22 }
 0x194   : > { %v894_v28 = vmul.f32 %v2151_v11, %v887_v23  ;;  %v1226_v11 = vld [vmem:[#allocation10 + $0x1f0] sm:$0xff]  ;;  %v1187_v23 = vld [vmem:[#allocation10 + $0xb8] sm:$0xff] }
 0x196   : > { %v2162_v31 = vpop.eup %2161  ;;  %v900_v32 = vadd.f32 %v2152_v14, %v894_v28  ;;  %v1189_v14 = vld [vmem:[#allocation10 + $0xc8] sm:$0xff] }
 0x197   : > { %1071 = vmatmul.f32.vlgmr.msrb.gmra.mxu3 %v2162_v31  ;;  %v910_v34 = vrot.slane %v2162_v31, 6  ;;  %v915_v35 = vrot.slane %v2162_v31, 7  ;;  %v919_v44 = vrot.slane %v2162_v31, 1  ;;  %v924_v52 = vrot.slane %v2162_v31, 2  ;;  %v1201_v28 = vld [vmem:[#allocation10 + $0x128] sm:$0xff]  ;;  %v1242_v31 = vld [vmem:[#allocation10 + $0x270] sm:$0xff] }
 0x198   : > { %2163 = vtanh.f32 %v900_v32  ;;  %1273 = vmatpush.msra.mxu3 %v1189_v14  ;;  %1300 = vmatpush.msrb.mxu0 %v1201_v28  ;;  %v1200_v32 = vld [vmem:[#allocation10 + $0x120] sm:$0xff]  ;;  %v2153_v14 = vld [vmem:[%s2861_s5] ss:$0 sm:$0xff] }
 0x199   : > { %v913_v37 = vsel %vm673_vm1, %v2675_v25, %v910_v34  ;;  %v918_v38 = vsel %vm679_vm2, %v2677_v26, %v915_v35 }
 0x19a   : > { %1025 = vmatmul.f32.vlgmr.msrb.gmra.mxu1 %v913_v37  ;;  %1048 = vmatmul.f32.vlgmr.msrb.gmra.mxu2 %v918_v38  ;;  %v1184_v37 = vld [vmem:[#allocation10 + $0xa0] sm:$0xff] }
 0x19b   : > { %1313 = vmatpush.msrb.mxu1 %v1227_v7  ;;  %1274 = vmatpush.msra.mxu3 %v1188_v19  ;;  %v1220_v38 = vld [vmem:[#allocation10 + $0x1c0] sm:$0xff]  ;;  %v2154_v19 = vld [vmem:[%s2862_s6] ss:$0 sm:$0xff] }
 0x19c   : > { %1336 = vmatpush.msrb.mxu2 %v1243_v27  ;;  %1301 = vmatpush.msrb.mxu0 %v1200_v32 }
 0x19d   : > { %1314 = vmatpush.msrb.mxu1 %v1226_v11  ;;  %1275 = vmatpush.msra.mxu3 %v1187_v23 }
 0x19e   : > { %v2164_v41 = vpop.eup %2163  ;;  %1337 = vmatpush.msrb.mxu2 %v1242_v31  ;;  %1302 = vmatpush.msrb.mxu0 %v1199_v36  ;;  %v1413_v31 = vld [vmem:[#allocation12 + $0x70] sm:$0xff] }
 0x19f   : > { %1074 = vmatmul.f32.gmra.mxu3 %v2164_v41  ;;  %v911_v42 = vrot.slane %v2164_v41, 6  ;;  %v916_v43 = vrot.slane %v2164_v41, 7  ;;  %v920_v45 = vrot.slane %v2164_v41, 1  ;;  %v925_v51 = vrot.slane %v2164_v41, 2  ;;  %1315 = vmatpush.msrb.mxu1 %v1225_v15  ;;  %v1183_v41 = vld [vmem:[#allocation10 + $0x98] sm:$0xff]  ;;  %v1228_v15 = vld [vmem:[#allocation10 + $0x200] sm:$0xff] }
 0x1a0   : > { %1276 = vmatpush.msra.mxu3 %v1186_v29  ;;  %1303 = vmatpush.msrb.mxu0 %v1198_v40 }
 0x1a1   : > { %v912_v47 = vsel %vm673_vm1, %v910_v34, %v911_v42  ;;  %v917_v48 = vsel %vm679_vm2, %v915_v35, %v916_v43  ;;  %v923_v49 = vsel %vm685_vm3, %v919_v44, %v920_v45  ;;  %v928_v53 = vsel %vm691_vm4, %v924_v52, %v925_v51  ;;  %1316 = vmatpush.msrb.mxu1 %v1224_v20  ;;  %v1221_v34 = vld [vmem:[#allocation10 + $0x1c8] sm:$0xff]  ;;  %v1219_v42 = vld [vmem:[#allocation10 + $0x1b8] sm:$0xff] }
 0x1a2   : > { %1028 = vmatmul.f32.gmra.mxu1 %v912_v47  ;;  %1051 = vmatmul.f32.gmra.mxu2 %v917_v48  ;;  %v922_v54 = vsel %vm685_vm3, %v920_v45, %v2698_v46  ;;  %v927_v55 = vsel %vm691_vm4, %v925_v51, %v2706_v50  ;;  %v1241_v35 = vld [vmem:[#allocation10 + $0x268] sm:$0xff]  ;;  %v1239_v43 = vld [vmem:[#allocation10 + $0x258] sm:$0xff]  ;;  %v1182_v45 = vld [vmem:[#allocation10 + $0x90] sm:$0xff] }
 0x1a3   : > { %1094 = vmatmul.f32.vlgmr.msra.gmra.mxu0 %v923_v49  ;;  %1317 = vmatpush.msrb.mxu1 %v1223_v24  ;;  %v1197_v44 = vld [vmem:[#allocation10 + $0x108] sm:$0xff]  ;;  %v1218_v47 = vld [vmem:[#allocation10 + $0x1b0] sm:$0xff]  ;;  %v1196_v49 = vld [vmem:[#allocation10 + $0x100] sm:$0xff] }
 0x1a4   : > { %1277 = vmatpush.msra.mxu3 %v1185_v33  ;;  %1338 = vmatpush.msrb.mxu2 %v1241_v35  ;;  %v1238_v48 = vld [vmem:[#allocation10 + $0x250] sm:$0xff]  ;;  %v1181_v51 = vld [vmem:[#allocation10 + $0x88] sm:$0xff] }
 0x1a5   : > { %1318 = vmatpush.msrb.mxu1 %v1222_v30  ;;  %1304 = vmatpush.msrb.mxu0 %v1197_v44  ;;  %v1217_v52 = vld [vmem:[#allocation10 + $0x1a8] sm:$0xff]  ;;  %v1414_v30 = vld [vmem:[#allocation12 + $0x78] sm:$0xff] }
 0x1a6   : > { %1278 = vmatpush.msra.mxu3 %v1184_v37  ;;  %1339 = vmatpush.msrb.mxu2 %v1240_v39 }
 0x1a7   : > { %1319 = vmatpush.msrb.mxu1 %v1221_v34  ;;  %1305 = vmatpush.msrb.mxu0 %v1196_v49 }
 0x1a8   : > { %1279 = vmatpush.msra.mxu3 %v1183_v41  ;;  %1340 = vmatpush.msrb.mxu2 %v1239_v43 }
 0x1a9   : > { %1320 = vmatpush.msrb.mxu1 %v1220_v38 }
 0x1aa   : > { %1117 = vmatmul.f32.vlgmr.msra.gmra.mxu1 %v928_v53  ;;  %1280 = vmatpush.msra.mxu3 %v1182_v45  ;;  %v1237_v53 = vld [vmem:[#allocation10 + $0x248] sm:$0xff] }
 0x1ab   : > { %1097 = vmatmul.f32.gmra.mxu0 %v922_v54  ;;  %1321 = vmatpush.msrb.mxu1 %v1219_v42  ;;  %v1180_v54 = vld [vmem:[#allocation10 + $0x80] sm:$0xff] }
 0x1ac   : > { %1341 = vmatpush.msrb.mxu2 %v1238_v48  ;;  %1281 = vmatpush.msra.mxu3 %v1181_v51 }
 0x1ad   : > { %1322 = vmatpush.msrb.mxu1 %v1218_v47 }
 0x1ae   : > { %1342 = vmatpush.msrb.mxu2 %v1237_v53  ;;  %1282 = vmatpush.msra.mxu3 %v1180_v54  ;;  %v1412_v54 = vld [vmem:[#allocation12 + $0x68] sm:$0xff] }
 0x1af   : > { %1323 = vmatpush.msrb.mxu1 %v1217_v52 }
 0x1b0   : > { %1343 = vmatpush.msrb.mxu2 %v1236_v56  ;;  %1479 = vmatpush.msrb.mxu3 %v1414_v30  ;;  %v1410_v56 = vld [vmem:[#allocation12 + $0x58] sm:$0xff] }
 0x1b1   : > { %v1458_v30 = vld [vmem:[#allocation12 + $0x1d8] sm:$0xff] }
 0x1b2   : > { %1120 = vmatmul.f32.gmra.mxu1 %v927_v55  ;;  %v1216_v55 = vld [vmem:[#allocation10 + $0x1a0] sm:$0xff]  ;;  %1344 = vmatpush.msrb.mxu2 %v1235_v59  ;;  %v1446_v59 = vld [vmem:[#allocation12 + $0x178] sm:$0xff] }
 0x1b3   : > { %1324 = vmatpush.msrb.mxu1 %v1216_v55  ;;  %1480 = vmatpush.msrb.mxu3 %v1413_v31  ;;  %v1411_v55 = vld [vmem:[#allocation12 + $0x60] sm:$0xff]  ;;  %v1478_v31 = vld [vmem:[#allocation12 + $0x278] sm:$0xff] }
 0x1b4   : > { %1345 = vmatpush.msrb.mxu2 %v1234_v61  ;;  %v1445_v61 = vld [vmem:[#allocation12 + $0x170] sm:$0xff] }
 0x1b5   : > { %1325 = vmatpush.msrb.mxu1 %v1215_v58  ;;  %1481 = vmatpush.msrb.mxu3 %v1412_v54  ;;  %v1408_v58 = vld [vmem:[#allocation12 + $0x48] sm:$0xff]  ;;  %v1431_v54 = vld [vmem:[#allocation12 + $0x100] sm:$0xff] }
 0x1b6   : > { %1346 = vmatpush.msrb.mxu2 %v1233_v0  ;;  %v1444_v0 = vld [vmem:[#allocation12 + $0x168] sm:$0xff] }
 0x1b7   : > { %1326 = vmatpush.msrb.mxu1 %v1214_v60  ;;  %1482 = vmatpush.msrb.mxu3 %v1411_v55  ;;  %v1407_v60 = vld [vmem:[#allocation12 + $0x40] sm:$0xff]  ;;  %v1416_v55 = vld [vmem:[#allocation12 + $0x88] sm:$0xff] }
 0x1b8   : > { %1347 = vmatpush.msrb.mxu2 %v1232_v3  ;;  %v1443_v3 = vld [vmem:[#allocation12 + $0x160] sm:$0xff] }
 0x1b9   : > { %1327 = vmatpush.msrb.mxu1 %v1213_v63  ;;  %1483 = vmatpush.msrb.mxu3 %v1410_v56  ;;  %v1406_v63 = vld [vmem:[#allocation12 + $0x38] sm:$0xff]  ;;  %v1452_v56 = vld [vmem:[#allocation12 + $0x1a8] sm:$0xff] }
 0x1ba   : > { %1348 = vmatpush.msrb.mxu2 %v1231_v6  ;;  %v1442_v6 = vld [vmem:[#allocation12 + $0x158] sm:$0xff] }
 0x1bb   : > { %1328 = vmatpush.msrb.mxu1 %v1212_v1  ;;  %v1429_v1 = vld [vmem:[#allocation12 + $0xf0] sm:$0xff] }
 0x1bc   : > { %1349 = vmatpush.msrb.mxu2 %v1230_v8  ;;  %v1403_v8 = vld [vmem:[#allocation12 + $0x20] sm:$0xff] }
 0x1bd   : > { %1525 = vmatpush.msra.mxu1 %v1446_v59  ;;  %v1451_v59 = vld [vmem:[#allocation12 + $0x1a0] sm:$0xff] }
 0x1be   : > { %1350 = vmatpush.msrb.mxu2 %v1229_v10  ;;  %v1426_v10 = vld [vmem:[#allocation12 + $0xd8] sm:$0xff] }
 0x1bf   : > { %1526 = vmatpush.msra.mxu1 %v1445_v61 }
 0x1c0   : > { %1351 = vmatpush.msrb.mxu2 %v1228_v15  ;;  %v1461_v15 = vld [vmem:[#allocation12 + $0x1f0] sm:$0xff] }
 0x1c1   : > { %1527 = vmatpush.msra.mxu1 %v1444_v0 }
 0x1c3   : > { %1528 = vmatpush.msra.mxu1 %v1443_v3  ;;  %v1448_v3 = vld [vmem:[#allocation12 + $0x188] sm:$0xff] }
 0x1c5   : > { %1529 = vmatpush.msra.mxu1 %v1442_v6 }
 0x217   : > { %v1026_v57 = vpop.f32.mrf.mxu1 }
 0x21a   : > { %v1072_v4 = vpop.f32.mrf.mxu3 }
 0x21d   : > { %v1049_v62 = vpop.f32.mrf.mxu2 }
 0x21e   : > { %v1050_v2 = vadd.f32 %v1049_v62, %v1026_v57  ;;  %v1409_v57 = vld [vmem:[#allocation12 + $0x50] sm:$0xff]  ;;  %v1430_v62 = vld [vmem:[#allocation12 + $0xf8] sm:$0xff] }
 0x21f   : > { %v1029_v5 = vpop.f32.mrf.mxu1  ;;  %1484 = vmatpush.msrb.mxu3 %v1409_v57  ;;  %1502 = vmatpush.msra.mxu0 %v1430_v62  ;;  %v1472_v57 = vld [vmem:[#allocation12 + $0x248] sm:$0xff]  ;;  %v1450_v62 = vld [vmem:[#allocation12 + $0x198] sm:$0xff] }
 0x220   : > { %v1073_v7 = vadd.f32 %v1072_v4, %v1050_v2  ;;  %v1095_v9 = vpop.f32.mrf.mxu0  ;;  %v1405_v2 = vld [vmem:[#allocation12 + $0x30] sm:$0xff]  ;;  %v1428_v4 = vld [vmem:[#allocation12 + $0xe8] sm:$0xff] }
 0x221   : > { %1485 = vmatpush.msrb.mxu3 %v1408_v58  ;;  %1503 = vmatpush.msra.mxu0 %v1429_v1  ;;  %v1415_v58 = vld [vmem:[#allocation12 + $0x80] sm:$0xff]  ;;  %v1449_v1 = vld [vmem:[#allocation12 + $0x190] sm:$0xff] }
 0x222   : > { %v1096_v12 = vadd.f32 %v1095_v9, %v1073_v7  ;;  %v1075_v20 = vpop.f32.mrf.mxu3  ;;  %v1427_v7 = vld [vmem:[#allocation12 + $0xe0] sm:$0xff]  ;;  %v1441_v9 = vld [vmem:[#allocation12 + $0x150] sm:$0xff] }
 0x223   : > { %1486 = vmatpush.msrb.mxu3 %v1407_v60  ;;  %1504 = vmatpush.msra.mxu0 %v1428_v4  ;;  %v1471_v60 = vld [vmem:[#allocation12 + $0x240] sm:$0xff]  ;;  %v1468_v4 = vld [vmem:[#allocation12 + $0x228] sm:$0xff] }
 0x224   : > { %1530 = vmatpush.msra.mxu1 %v1441_v9 }
 0x225   : > { %v1052_v11 = vpop.f32.mrf.mxu2  ;;  %1487 = vmatpush.msrb.mxu3 %v1406_v63  ;;  %1505 = vmatpush.msra.mxu0 %v1427_v7  ;;  %v1470_v63 = vld [vmem:[#allocation12 + $0x238] sm:$0xff]  ;;  %v1467_v7 = vld [vmem:[#allocation12 + $0x220] sm:$0xff] }
 0x226   : > { %v1053_v13 = vadd.f32 %v1052_v11, %v1029_v5  ;;  %v1404_v5 = vld [vmem:[#allocation12 + $0x28] sm:$0xff]  ;;  %v1462_v11 = vld [vmem:[#allocation12 + $0x1f8] sm:$0xff] }
 0x227   : > { %v1118_v16 = vpop.f32.mrf.mxu1  ;;  %1488 = vmatpush.msrb.mxu3 %v1405_v2  ;;  %1506 = vmatpush.msra.mxu0 %v1426_v10  ;;  %v1469_v2 = vld [vmem:[#allocation12 + $0x230] sm:$0xff]  ;;  %v1466_v10 = vld [vmem:[#allocation12 + $0x218] sm:$0xff] }
 0x228   : > { %v1119_v17 = vadd.f32 %v1118_v16, %v1096_v12  ;;  %v1076_v21 = vadd.f32 %v1075_v20, %v1053_v13  ;;  %v1098_v24 = vpop.f32.mrf.mxu0  ;;  %v1402_v12 = vld [vmem:[#allocation12 + $0x18] sm:$0xff]  ;;  %v1440_v13 = vld [vmem:[#allocation12 + $0x148] sm:$0xff]  ;;  %v1401_v16 = vld [vmem:[#allocation12 + $0x10] sm:$0xff] }
 0x229   : > { %1489 = vmatpush.msrb.mxu3 %v1404_v5  ;;  %1531 = vmatpush.msra.mxu1 %v1440_v13  ;;  %v1460_v20 = vld [vmem:[#allocation12 + $0x1e8] sm:$0xff]  ;;  %v1447_v5 = vld [vmem:[#allocation12 + $0x180] sm:$0xff] }
 0x22a   : > { %v1128_v22 = vmul.f32 %v2153_v14, %v1119_v17  ;;  %v1099_v27 = vadd.f32 %v1098_v24, %v1076_v21  ;;  %v1439_v17 = vld [vmem:[#allocation12 + $0x140] sm:$0xff]  ;;  %v1400_v21 = vld [vmem:[#allocation12 + $0x8] sm:$0xff] }
 0x22b   : > { %1490 = vmatpush.msrb.mxu3 %v1403_v8  ;;  %1532 = vmatpush.msra.mxu1 %v1439_v17  ;;  %v1459_v24 = vld [vmem:[#allocation12 + $0x1e0] sm:$0xff] }
 0x22c   : > { %v1134_v23 = vadd.f32 %v2154_v19, %v1128_v22  ;;  %v1438_v22 = vld [vmem:[#allocation12 + $0x138] sm:$0xff] }
 0x22d   : > { %1491 = vmatpush.msrb.mxu3 %v1402_v12  ;;  %1533 = vmatpush.msra.mxu1 %v1438_v22  ;;  %v1465_v12 = vld [vmem:[#allocation12 + $0x210] sm:$0xff] }
 0x22e   : > { %2165 = vtanh.f32 %v1134_v23  ;;  %v1423_v23 = vld [vmem:[#allocation12 + $0xc0] sm:$0xff] }
 0x22f   : > { %v1121_v28 = vpop.f32.mrf.mxu1  ;;  %1492 = vmatpush.msrb.mxu3 %v1401_v16 }
 0x230   : > { %v1122_v29 = vadd.f32 %v1121_v28, %v1099_v27  ;;  %v1399_v27 = vld [vmem:[#allocation12] sm:$0xff]  ;;  %v1437_v28 = vld [vmem:[#allocation12 + $0x130] sm:$0xff] }
 0x231   : > { %1493 = vmatpush.msrb.mxu3 %v1400_v21  ;;  %1534 = vmatpush.msra.mxu1 %v1437_v28 }
 0x232   : > { %v1129_v32 = vmul.f32 %v2153_v14, %v1122_v29  ;;  %v1425_v14 = vld [vmem:[#allocation12 + $0xd0] sm:$0xff]  ;;  %v1422_v29 = vld [vmem:[#allocation12 + $0xb8] sm:$0xff] }
 0x233   : > { %1507 = vmatpush.msra.mxu0 %v1425_v14  ;;  %1494 = vmatpush.msrb.mxu3 %v1399_v27 }
 0x234   : > { %v2166_v33 = vpop.eup %2165  ;;  %v1135_v34 = vadd.f32 %v2154_v19, %v1129_v32  ;;  %v1424_v19 = vld [vmem:[#allocation12 + $0xc8] sm:$0xff] }
 0x235   : > { %1306 = vmatmul.f32.vlgmr.msrb.gmra.mxu0 %v2166_v33  ;;  %v1145_v35 = vrot.slane %v2166_v33, 6  ;;  %v1150_v36 = vrot.slane %v2166_v33, 7  ;;  %v1154_v42 = vrot.slane %v2166_v33, 1  ;;  %v1159_v49 = vrot.slane %v2166_v33, 2  ;;  %v1436_v32 = vld [vmem:[#allocation12 + $0x128] sm:$0xff]  ;;  %v1421_v33 = vld [vmem:[#allocation12 + $0xb0] sm:$0xff] }
 0x236   : > { %2167 = vtanh.f32 %v1135_v34  ;;  %1508 = vmatpush.msra.mxu0 %v1424_v19  ;;  %1535 = vmatpush.msra.mxu1 %v1436_v32  ;;  %v1457_v34 = vld [vmem:[#allocation12 + $0x1d0] sm:$0xff] }
 0x237   : > { %v1148_v37 = vsel %vm673_vm1, %v2675_v25, %v1145_v35  ;;  %v1153_v38 = vsel %vm679_vm2, %v2677_v26, %v1150_v36  ;;  %v2155_v19 = vld [vmem:[%s2864_s8] ss:$0 sm:$0xff] }
 0x238   : > { %1260 = vmatmul.f32.vlgmr.msra.gmra.mxu2 %v1148_v37  ;;  %1283 = vmatmul.f32.vlgmr.msra.gmra.mxu3 %v1153_v38  ;;  %v1420_v37 = vld [vmem:[#allocation12 + $0xa8] sm:$0xff] }
 0x239   : > { %1548 = vmatpush.msra.mxu2 %v1462_v11  ;;  %1509 = vmatpush.msra.mxu0 %v1423_v23  ;;  %v1456_v38 = vld [vmem:[#allocation12 + $0x1c8] sm:$0xff]  ;;  %v2156_v23 = vld [vmem:[%s2865_s9] ss:$0 sm:$0xff] }
 0x23a   : > { %1571 = vmatpush.msra.mxu3 %v1478_v31 }
 0x23b   : > { %1549 = vmatpush.msra.mxu2 %v1461_v15  ;;  %1510 = vmatpush.msra.mxu0 %v1422_v29  ;;  %v1464_v15 = vld [vmem:[#allocation12 + $0x208] sm:$0xff] }
 0x23c   : > { %v2168_v39 = vpop.eup %2167 }
 0x23d   : > { %1309 = vmatmul.f32.gmra.mxu0 %v2168_v39  ;;  %v1146_v40 = vrot.slane %v2168_v39, 6  ;;  %v1151_v41 = vrot.slane %v2168_v39, 7  ;;  %v1155_v43 = vrot.slane %v2168_v39, 1  ;;  %v1160_v48 = vrot.slane %v2168_v39, 2  ;;  %1550 = vmatpush.msra.mxu2 %v1460_v20  ;;  %v1476_v39 = vld [vmem:[#allocation12 + $0x268] sm:$0xff]  ;;  %v1463_v20 = vld [vmem:[#allocation12 + $0x200] sm:$0xff] }
 0x23e   : > { %1511 = vmatpush.msra.mxu0 %v1421_v33 }
 0x23f   : > { %v1147_v44 = vsel %vm673_vm1, %v1145_v35, %v1146_v40  ;;  %v1152_v45 = vsel %vm679_vm2, %v1150_v36, %v1151_v41  ;;  %v1158_v47 = vsel %vm685_vm3, %v1154_v42, %v1155_v43  ;;  %v1163_v51 = vsel %vm691_vm4, %v1159_v49, %v1160_v48  ;;  %1551 = vmatpush.msra.mxu2 %v1459_v24  ;;  %v1477_v35 = vld [vmem:[#allocation12 + $0x270] sm:$0xff]  ;;  %v1435_v36 = vld [vmem:[#allocation12 + $0x120] sm:$0xff]  ;;  %v1434_v40 = vld [vmem:[#allocation12 + $0x118] sm:$0xff] }
 0x240   : > { %1263 = vmatmul.f32.gmra.mxu2 %v1147_v44  ;;  %1286 = vmatmul.f32.gmra.mxu3 %v1152_v45  ;;  %v1157_v52 = vsel %vm685_vm3, %v1155_v43, %v2698_v46  ;;  %v1162_v53 = vsel %vm691_vm4, %v1160_v48, %v2706_v50  ;;  %v1419_v41 = vld [vmem:[#allocation12 + $0xa0] sm:$0xff]  ;;  %v1433_v44 = vld [vmem:[#allocation12 + $0x110] sm:$0xff]  ;;  %v1418_v45 = vld [vmem:[#allocation12 + $0x98] sm:$0xff] }
 0x241   : > { %1329 = vmatmul.f32.vlgmr.msrb.gmra.mxu1 %v1158_v47  ;;  %1552 = vmatpush.msra.mxu2 %v1458_v30  ;;  %v1455_v42 = vld [vmem:[#allocation12 + $0x1c0] sm:$0xff]  ;;  %v1454_v47 = vld [vmem:[#allocation12 + $0x1b8] sm:$0xff]  ;;  %v1432_v49 = vld [vmem:[#allocation12 + $0x108] sm:$0xff] }
 0x242   : > { %1572 = vmatpush.msra.mxu3 %v1477_v35  ;;  %1536 = vmatpush.msra.mxu1 %v1435_v36  ;;  %v1475_v43 = vld [vmem:[#allocation12 + $0x260] sm:$0xff]  ;;  %v1474_v48 = vld [vmem:[#allocation12 + $0x258] sm:$0xff]  ;;  %v1648_v36 = vld [vmem:[#allocation13 + $0x70] sm:$0xff] }
 0x243   : > { %1553 = vmatpush.msra.mxu2 %v1457_v34  ;;  %1512 = vmatpush.msra.mxu0 %v1420_v37  ;;  %v1649_v34 = vld [vmem:[#allocation13 + $0x78] sm:$0xff]  ;;  %v1664_v37 = vld [vmem:[#allocation13 + $0xf0] sm:$0xff] }
 0x244   : > { %1573 = vmatpush.msra.mxu3 %v1476_v39  ;;  %1537 = vmatpush.msra.mxu1 %v1434_v40  ;;  %v1665_v35 = vld [vmem:[#allocation13 + $0xf8] sm:$0xff] }
 0x245   : > { %1554 = vmatpush.msra.mxu2 %v1456_v38  ;;  %1513 = vmatpush.msra.mxu0 %v1419_v41 }
 0x246   : > { %1574 = vmatpush.msra.mxu3 %v1475_v43  ;;  %1538 = vmatpush.msra.mxu1 %v1433_v44 }
 0x247   : > { %1555 = vmatpush.msra.mxu2 %v1455_v42  ;;  %1514 = vmatpush.msra.mxu0 %v1418_v45 }
 0x248   : > { %1352 = vmatmul.f32.vlgmr.msrb.gmra.mxu2 %v1163_v51  ;;  %1575 = vmatpush.msra.mxu3 %v1474_v48  ;;  %v1417_v51 = vld [vmem:[#allocation12 + $0x90] sm:$0xff] }
 0x249   : > { %1332 = vmatmul.f32.gmra.mxu1 %v1157_v52  ;;  %1556 = vmatpush.msra.mxu2 %v1454_v47  ;;  %v1453_v52 = vld [vmem:[#allocation12 + $0x1b0] sm:$0xff] }
 0x24a   : > { %1539 = vmatpush.msra.mxu1 %v1432_v49  ;;  %1515 = vmatpush.msra.mxu0 %v1417_v51 }
 0x24b   : > { %1557 = vmatpush.msra.mxu2 %v1453_v52 }
 0x24c   : > { %1540 = vmatpush.msra.mxu1 %v1431_v54  ;;  %1516 = vmatpush.msra.mxu0 %v1416_v55 }
 0x24d   : > { %1558 = vmatpush.msra.mxu2 %v1452_v56 }
 0x24e   : > { %1517 = vmatpush.msra.mxu0 %v1415_v58  ;;  %1737 = vmatpush.msrb.mxu1 %v1665_v35  ;;  %v1651_v35 = vld [vmem:[#allocation13 + $0x88] sm:$0xff] }
 0x24f   : > { %1559 = vmatpush.msra.mxu2 %v1451_v59 }
 0x250   : > { %1355 = vmatmul.f32.gmra.mxu2 %v1162_v53  ;;  %v1473_v53 = vld [vmem:[#allocation12 + $0x250] sm:$0xff]  ;;  %1714 = vmatpush.msrb.mxu0 %v1649_v34  ;;  %v1635_v34 = vld [vmem:[#allocation13 + $0x8] sm:$0xff] }
 0x251   : > { %1576 = vmatpush.msra.mxu3 %v1473_v53  ;;  %1560 = vmatpush.msra.mxu2 %v1450_v62  ;;  %v1646_v62 = vld [vmem:[#allocation13 + $0x60] sm:$0xff] }
 0x252   : > { %1715 = vmatpush.msrb.mxu0 %v1648_v36  ;;  %1738 = vmatpush.msrb.mxu1 %v1664_v37  ;;  %v1673_v36 = vld [vmem:[#allocation13 + $0x138] sm:$0xff]  ;;  %v1694_v37 = vld [vmem:[#allocation13 + $0x1e0] sm:$0xff] }
 0x253   : > { %1577 = vmatpush.msra.mxu3 %v1472_v57  ;;  %1561 = vmatpush.msra.mxu2 %v1449_v1  ;;  %v1661_v1 = vld [vmem:[#allocation13 + $0xd8] sm:$0xff] }
 0x255   : > { %1578 = vmatpush.msra.mxu3 %v1471_v60  ;;  %1562 = vmatpush.msra.mxu2 %v1448_v3  ;;  %v1647_v60 = vld [vmem:[#allocation13 + $0x68] sm:$0xff]  ;;  %v1660_v3 = vld [vmem:[#allocation13 + $0xd0] sm:$0xff] }
 0x256   : > { %1716 = vmatpush.msrb.mxu0 %v1647_v60  ;;  %v1666_v60 = vld [vmem:[#allocation13 + $0x100] sm:$0xff] }
 0x257   : > { %1579 = vmatpush.msra.mxu3 %v1470_v63  ;;  %1563 = vmatpush.msra.mxu2 %v1447_v5  ;;  %v1662_v63 = vld [vmem:[#allocation13 + $0xe0] sm:$0xff]  ;;  %v1659_v5 = vld [vmem:[#allocation13 + $0xc8] sm:$0xff] }
 0x258   : > { %1717 = vmatpush.msrb.mxu0 %v1646_v62  ;;  %v1707_v62 = vld [vmem:[#allocation13 + $0x248] sm:$0xff] }
 0x259   : > { %1580 = vmatpush.msra.mxu3 %v1469_v2  ;;  %v1644_v2 = vld [vmem:[#allocation13 + $0x50] sm:$0xff] }
 0x25b   : > { %1581 = vmatpush.msra.mxu3 %v1468_v4  ;;  %v1643_v4 = vld [vmem:[#allocation13 + $0x48] sm:$0xff] }
 0x25d   : > { %1582 = vmatpush.msra.mxu3 %v1467_v7  ;;  %v1642_v7 = vld [vmem:[#allocation13 + $0x40] sm:$0xff] }
 0x25f   : > { %1583 = vmatpush.msra.mxu3 %v1466_v10  ;;  %v1641_v10 = vld [vmem:[#allocation13 + $0x38] sm:$0xff] }
 0x261   : > { %1584 = vmatpush.msra.mxu3 %v1465_v12  ;;  %v1679_v12 = vld [vmem:[#allocation13 + $0x168] sm:$0xff] }
 0x263   : > { %1585 = vmatpush.msra.mxu3 %v1464_v15  ;;  %v1678_v15 = vld [vmem:[#allocation13 + $0x160] sm:$0xff] }
 0x265   : > { %1586 = vmatpush.msra.mxu3 %v1463_v20  ;;  %v1638_v20 = vld [vmem:[#allocation13 + $0x20] sm:$0xff] }
 0x2b2   : > { %v1307_v8 = vpop.f32.mrf.mxu0 }
 0x2ba   : > { %v1310_v24 = vpop.f32.mrf.mxu0 }
 0x2bb   : > { %v1261_v61 = vpop.f32.mrf.mxu2  ;;  %v1284_v0 = vpop.f32.mrf.mxu3 }
 0x2bc   : > { %v1285_v6 = vadd.f32 %v1284_v0, %v1261_v61  ;;  %v1663_v61 = vld [vmem:[#allocation13 + $0xe8] sm:$0xff]  ;;  %v1645_v0 = vld [vmem:[#allocation13 + $0x58] sm:$0xff] }
 0x2bd   : > { %1739 = vmatpush.msrb.mxu1 %v1663_v61  ;;  %1718 = vmatpush.msrb.mxu0 %v1645_v0  ;;  %v1687_v61 = vld [vmem:[#allocation13 + $0x1a8] sm:$0xff]  ;;  %v1706_v0 = vld [vmem:[#allocation13 + $0x240] sm:$0xff] }
 0x2be   : > { %v1308_v11 = vadd.f32 %v1307_v8, %v1285_v6  ;;  %v1330_v13 = vpop.f32.mrf.mxu1  ;;  %v1681_v6 = vld [vmem:[#allocation13 + $0x178] sm:$0xff]  ;;  %v1658_v8 = vld [vmem:[#allocation13 + $0xc0] sm:$0xff] }
 0x2bf   : > { %1740 = vmatpush.msrb.mxu1 %v1662_v63  ;;  %1719 = vmatpush.msrb.mxu0 %v1644_v2  ;;  %v1686_v63 = vld [vmem:[#allocation13 + $0x1a0] sm:$0xff]  ;;  %v1685_v2 = vld [vmem:[#allocation13 + $0x198] sm:$0xff] }
 0x2c0   : > { %v1331_v16 = vadd.f32 %v1330_v13, %v1308_v11  ;;  %1760 = vmatpush.msrb.mxu2 %v1681_v6  ;;  %v1657_v11 = vld [vmem:[#allocation13 + $0xb8] sm:$0xff]  ;;  %v1640_v13 = vld [vmem:[#allocation13 + $0x30] sm:$0xff] }
 0x2c1   : > { %1741 = vmatpush.msrb.mxu1 %v1661_v1  ;;  %1720 = vmatpush.msrb.mxu0 %v1643_v4  ;;  %v1684_v4 = vld [vmem:[#allocation13 + $0x190] sm:$0xff] }
 0x2c3   : > { %v1264_v9 = vpop.f32.mrf.mxu2  ;;  %v1287_v14 = vpop.f32.mrf.mxu3  ;;  %1742 = vmatpush.msrb.mxu1 %v1660_v3  ;;  %1721 = vmatpush.msrb.mxu0 %v1642_v7  ;;  %v1705_v3 = vld [vmem:[#allocation13 + $0x238] sm:$0xff]  ;;  %v1683_v7 = vld [vmem:[#allocation13 + $0x188] sm:$0xff] }
 0x2c4   : > { %v1288_v17 = vadd.f32 %v1287_v14, %v1264_v9  ;;  %v1680_v9 = vld [vmem:[#allocation13 + $0x170] sm:$0xff] }
 0x2c5   : > { %1743 = vmatpush.msrb.mxu1 %v1659_v5  ;;  %1761 = vmatpush.msrb.mxu2 %v1680_v9  ;;  %v1656_v14 = vld [vmem:[#allocation13 + $0xb0] sm:$0xff]  ;;  %v1682_v9 = vld [vmem:[#allocation13 + $0x180] sm:$0xff] }
 0x2c6   : > { %v1311_v27 = vadd.f32 %v1310_v24, %v1288_v17  ;;  %v1333_v30 = vpop.f32.mrf.mxu1  ;;  %1722 = vmatpush.msrb.mxu0 %v1641_v10  ;;  %v1655_v17 = vld [vmem:[#allocation13 + $0xa8] sm:$0xff]  ;;  %v1637_v24 = vld [vmem:[#allocation13 + $0x18] sm:$0xff]  ;;  %v1704_v5 = vld [vmem:[#allocation13 + $0x230] sm:$0xff] }
 0x2c7   : > { %1744 = vmatpush.msrb.mxu1 %v1658_v8  ;;  %1762 = vmatpush.msrb.mxu2 %v1679_v12  ;;  %v1703_v8 = vld [vmem:[#allocation13 + $0x228] sm:$0xff]  ;;  %v1702_v10 = vld [vmem:[#allocation13 + $0x220] sm:$0xff] }
 0x2c8   : > { %v1334_v31 = vadd.f32 %v1333_v30, %v1311_v27  ;;  %1723 = vmatpush.msrb.mxu0 %v1640_v13  ;;  %v1653_v27 = vld [vmem:[#allocation13 + $0x98] sm:$0xff]  ;;  %v1636_v30 = vld [vmem:[#allocation13 + $0x10] sm:$0xff] }
 0x2c9   : > { %1745 = vmatpush.msrb.mxu1 %v1657_v11  ;;  %1763 = vmatpush.msrb.mxu2 %v1678_v15  ;;  %v1701_v15 = vld [vmem:[#allocation13 + $0x218] sm:$0xff] }
 0x2cb   : > { %v1353_v21 = vpop.f32.mrf.mxu2  ;;  %1746 = vmatpush.msrb.mxu1 %v1656_v14 }
 0x2cc   : > { %v1354_v22 = vadd.f32 %v1353_v21, %v1331_v16  ;;  %v1639_v16 = vld [vmem:[#allocation13 + $0x28] sm:$0xff]  ;;  %v1654_v21 = vld [vmem:[#allocation13 + $0xa0] sm:$0xff] }
 0x2cd   : > { %1724 = vmatpush.msrb.mxu0 %v1639_v16  ;;  %1747 = vmatpush.msrb.mxu1 %v1655_v17  ;;  %v1700_v16 = vld [vmem:[#allocation13 + $0x210] sm:$0xff] }
 0x2ce   : > { %v1363_v28 = vmul.f32 %v2155_v19, %v1354_v22  ;;  %v1676_v22 = vld [vmem:[#allocation13 + $0x150] sm:$0xff] }
 0x2cf   : > { %1725 = vmatpush.msrb.mxu0 %v1638_v20  ;;  %1748 = vmatpush.msrb.mxu1 %v1654_v21  ;;  %v2157_v21 = vld [vmem:[%s2867_s11] ss:$0 sm:$0xff] }
 0x2d0   : > { %v1369_v29 = vadd.f32 %v2156_v23, %v1363_v28  ;;  %v1675_v28 = vld [vmem:[#allocation13 + $0x148] sm:$0xff] }
 0x2d1   : > { %1726 = vmatpush.msrb.mxu0 %v1637_v24  ;;  %1749 = vmatpush.msrb.mxu1 %v1653_v27 }
 0x2d2   : > { %2169 = vtanh.f32 %v1369_v29  ;;  %v1696_v29 = vld [vmem:[#allocation13 + $0x1f0] sm:$0xff] }
 0x2d3   : > { %v1356_v32 = vpop.f32.mrf.mxu2  ;;  %1727 = vmatpush.msrb.mxu0 %v1636_v30 }
 0x2d4   : > { %v1357_v33 = vadd.f32 %v1356_v32, %v1334_v31  ;;  %v1652_v31 = vld [vmem:[#allocation13 + $0x90] sm:$0xff]  ;;  %v1674_v32 = vld [vmem:[#allocation13 + $0x140] sm:$0xff] }
 0x2d5   : > { %1750 = vmatpush.msrb.mxu1 %v1652_v31  ;;  %1728 = vmatpush.msrb.mxu0 %v1635_v34 }
 0x2d6   : > { %v1364_v38 = vmul.f32 %v2155_v19, %v1357_v33  ;;  %v1677_v19 = vld [vmem:[#allocation13 + $0x158] sm:$0xff]  ;;  %v1695_v33 = vld [vmem:[#allocation13 + $0x1e8] sm:$0xff] }
 0x2d7   : > { %1764 = vmatpush.msrb.mxu2 %v1677_v19  ;;  %1751 = vmatpush.msrb.mxu1 %v1651_v35  ;;  %v1699_v19 = vld [vmem:[#allocation13 + $0x208] sm:$0xff] }
 0x2d8   : > { %v2170_v39 = vpop.eup %2169  ;;  %v1370_v40 = vadd.f32 %v2156_v23, %v1364_v38  ;;  %v1697_v23 = vld [vmem:[#allocation13 + $0x1f8] sm:$0xff]  ;;  %v1634_v38 = vld [vmem:[#allocation13] sm:$0xff] }
 0x2d9   : > { %1541 = vmatmul.f32.vlgmr.msra.gmra.mxu1 %v2170_v39  ;;  %v1380_v41 = vrot.slane %v2170_v39, 6  ;;  %v1385_v42 = vrot.slane %v2170_v39, 7  ;;  %v1389_v49 = vrot.slane %v2170_v39, 1  ;;  %v1394_v56 = vrot.slane %v2170_v39, 2  ;;  %1765 = vmatpush.msrb.mxu2 %v1676_v22  ;;  %v1650_v39 = vld [vmem:[#allocation13 + $0x80] sm:$0xff] }
 0x2da   : > { %2171 = vtanh.f32 %v1370_v40  ;;  %v1672_v40 = vld [vmem:[#allocation13 + $0x130] sm:$0xff]  ;;  %1729 = vmatpush.msrb.mxu0 %v1634_v38  ;;  %1752 = vmatpush.msrb.mxu1 %v1650_v39  ;;  %v1698_v22 = vld [vmem:[#allocation13 + $0x200] sm:$0xff] }
 0x2db   : > { %v1383_v43 = vsel %vm673_vm1, %v2675_v25, %v1380_v41  ;;  %v1388_v44 = vsel %vm679_vm2, %v2677_v26, %v1385_v42  ;;  %1766 = vmatpush.msrb.mxu2 %v1675_v28 }
 0x2dc   : > { %1495 = vmatmul.f32.vlgmr.msrb.gmra.mxu3 %v1383_v43  ;;  %1518 = vmatmul.f32.vlgmr.msra.gmra.mxu0 %v1388_v44  ;;  %v1671_v43 = vld [vmem:[#allocation13 + $0x128] sm:$0xff]  ;;  %v1692_v44 = vld [vmem:[#allocation13 + $0x1d0] sm:$0xff] }
 0x2dd   : > { %1783 = vmatpush.msrb.mxu3 %v1697_v23  ;;  %1767 = vmatpush.msrb.mxu2 %v1674_v32 }
 0x2df   : > { %1784 = vmatpush.msrb.mxu3 %v1696_v29  ;;  %1768 = vmatpush.msrb.mxu2 %v1673_v36  ;;  %v2158_v29 = vld [vmem:[%s2898_s7] ss:$0 sm:$0xff]  ;;  %s1890_s7 = sshll.u32 %s621_s29, 4  ;;  %s1891_s7 = int_to_ptr.vmem [resolvable:$true] %s1890_s7 }
 0x2e0   : > { %v2172_v45 = vpop.eup %2171 }
 0x2e1   : > { %1544 = vmatmul.f32.gmra.mxu1 %v2172_v45  ;;  %v1381_v47 = vrot.slane %v2172_v45, 6  ;;  %v1386_v48 = vrot.slane %v2172_v45, 7  ;;  %v1390_v51 = vrot.slane %v2172_v45, 1  ;;  %v1395_v55 = vrot.slane %v2172_v45, 2  ;;  %1785 = vmatpush.msrb.mxu3 %v1695_v33  ;;  %v1712_v45 = vld [vmem:[#allocation13 + $0x270] sm:$0xff] }
 0x2e2   : > { %1769 = vmatpush.msrb.mxu2 %v1672_v40 }
 0x2e3   : > { %v1382_v52 = vsel %vm673_vm1, %v1380_v41, %v1381_v47  ;;  %v1387_v53 = vsel %vm679_vm2, %v1385_v42, %v1386_v48  ;;  %v1393_v54 = vsel %vm685_vm3, %v1389_v49, %v1390_v51  ;;  %v1398_v57 = vsel %vm691_vm4, %v1394_v56, %v1395_v55  ;;  %1786 = vmatpush.msrb.mxu3 %v1694_v37  ;;  %v1693_v41 = vld [vmem:[#allocation13 + $0x1d8] sm:$0xff]  ;;  %v1670_v47 = vld [vmem:[#allocation13 + $0x120] sm:$0xff]  ;;  %v1691_v48 = vld [vmem:[#allocation13 + $0x1c8] sm:$0xff] }
 0x2e4   : > { %1498 = vmatmul.f32.gmra.mxu3 %v1382_v52  ;;  %1521 = vmatmul.f32.gmra.mxu0 %v1387_v53  ;;  %v1392_v58 = vsel %vm685_vm3, %v1390_v51, %v2698_v46  ;;  %v1397_v59 = vsel %vm691_vm4, %v1395_v55, %v2706_v50  ;;  %v1713_v42 = vld [vmem:[#allocation13 + $0x278] sm:$0xff]  ;;  %v1711_v49 = vld [vmem:[#allocation13 + $0x268] sm:$0xff]  ;;  %v1690_v52 = vld [vmem:[#allocation13 + $0x1c0] sm:$0xff] }
 0x2e5   : > { %1564 = vmatmul.f32.vlgmr.msra.gmra.mxu2 %v1393_v54  ;;  %1787 = vmatpush.msrb.mxu3 %v1693_v41  ;;  %v1669_v51 = vld [vmem:[#allocation13 + $0x118] sm:$0xff]  ;;  %v1710_v53 = vld [vmem:[#allocation13 + $0x260] sm:$0xff]  ;;  %v1668_v54 = vld [vmem:[#allocation13 + $0x110] sm:$0xff] }
 0x2e6   : > { %1806 = vmatpush.msra.mxu0 %v1713_v42  ;;  %2035 = vmatpush.msra.mxu1 %v1713_v42  ;;  %v1689_v55 = vld [vmem:[#allocation13 + $0x1b8] sm:$0xff] }
 0x2e7   : > { %1770 = vmatpush.msrb.mxu2 %v1671_v43  ;;  %1788 = vmatpush.msrb.mxu3 %v1692_v44  ;;  %v1709_v56 = vld [vmem:[#allocation13 + $0x258] sm:$0xff] }
 0x2e8   : > { %1807 = vmatpush.msra.mxu0 %v1712_v45  ;;  %2036 = vmatpush.msra.mxu1 %v1712_v45 }
 0x2e9   : > { %1771 = vmatpush.msrb.mxu2 %v1670_v47  ;;  %1789 = vmatpush.msrb.mxu3 %v1691_v48 }
 0x2ea   : > { %1808 = vmatpush.msra.mxu0 %v1711_v49  ;;  %2037 = vmatpush.msra.mxu1 %v1711_v49 }
 0x2eb   : > { %1772 = vmatpush.msrb.mxu2 %v1669_v51  ;;  %1790 = vmatpush.msrb.mxu3 %v1690_v52 }
 0x2ec   : > { %1587 = vmatmul.f32.vlgmr.msra.gmra.mxu3 %v1398_v57  ;;  %1809 = vmatpush.msra.mxu0 %v1710_v53  ;;  %v1667_v57 = vld [vmem:[#allocation13 + $0x108] sm:$0xff] }
 0x2ed   : > { %1567 = vmatmul.f32.gmra.mxu2 %v1392_v58  ;;  %2038 = vmatpush.msra.mxu1 %v1710_v53  ;;  %v1688_v58 = vld [vmem:[#allocation13 + $0x1b0] sm:$0xff] }
 0x2ee   : > { %1773 = vmatpush.msrb.mxu2 %v1668_v54  ;;  %1791 = vmatpush.msrb.mxu3 %v1689_v55 }
 0x2ef   : > { %1810 = vmatpush.msra.mxu0 %v1709_v56  ;;  %2039 = vmatpush.msra.mxu1 %v1709_v56 }
 0x2f0   : > { %1774 = vmatpush.msrb.mxu2 %v1667_v57  ;;  %1792 = vmatpush.msrb.mxu3 %v1688_v58 }
 0x2f2   : > { %1775 = vmatpush.msrb.mxu2 %v1666_v60  ;;  %1793 = vmatpush.msrb.mxu3 %v1687_v61 }
 0x2f4   : > { %1590 = vmatmul.f32.gmra.mxu3 %v1397_v59  ;;  %v1708_v59 = vld [vmem:[#allocation13 + $0x250] sm:$0xff] }
 0x2f5   : > { %1811 = vmatpush.msra.mxu0 %v1708_v59  ;;  %2040 = vmatpush.msra.mxu1 %v1708_v59 }
 0x2f6   : > { %1794 = vmatpush.msrb.mxu3 %v1686_v63 }
 0x2f7   : > { %1812 = vmatpush.msra.mxu0 %v1707_v62  ;;  %2041 = vmatpush.msra.mxu1 %v1707_v62 }
 0x2f8   : > { %1795 = vmatpush.msrb.mxu3 %v1685_v2 }
 0x2f9   : > { %1813 = vmatpush.msra.mxu0 %v1706_v0  ;;  %2042 = vmatpush.msra.mxu1 %v1706_v0 }
 0x2fa   : > { %1796 = vmatpush.msrb.mxu3 %v1684_v4 }
 0x2fb   : > { %1814 = vmatpush.msra.mxu0 %v1705_v3  ;;  %2043 = vmatpush.msra.mxu1 %v1705_v3 }
 0x2fc   : > { %1797 = vmatpush.msrb.mxu3 %v1683_v7 }
 0x2fd   : > { %1815 = vmatpush.msra.mxu0 %v1704_v5  ;;  %2044 = vmatpush.msra.mxu1 %v1704_v5 }
 0x2fe   : > { %1798 = vmatpush.msrb.mxu3 %v1682_v9 }
 0x2ff   : > { %1816 = vmatpush.msra.mxu0 %v1703_v8  ;;  %2045 = vmatpush.msra.mxu1 %v1703_v8 }
 0x301   : > { %1817 = vmatpush.msra.mxu0 %v1702_v10  ;;  %2046 = vmatpush.msra.mxu1 %v1702_v10 }
 0x303   : > { %1818 = vmatpush.msra.mxu0 %v1701_v15  ;;  %2047 = vmatpush.msra.mxu1 %v1701_v15 }
 0x305   : > { %1819 = vmatpush.msra.mxu0 %v1700_v16  ;;  %2048 = vmatpush.msra.mxu1 %v1700_v16 }
 0x307   : > { %1820 = vmatpush.msra.mxu0 %v1699_v19  ;;  %2049 = vmatpush.msra.mxu1 %v1699_v19 }
 0x309   : > { %1821 = vmatpush.msra.mxu0 %v1698_v22  ;;  %2050 = vmatpush.msra.mxu1 %v1698_v22 }
 0x356   : > { %v1542_v13 = vpop.f32.mrf.mxu1 }
 0x359   : > { %v1519_v6 = vpop.f32.mrf.mxu0 }
 0x35e   : > { %v1545_v31 = vpop.f32.mrf.mxu1 }
 0x35f   : > { %v1496_v1 = vpop.f32.mrf.mxu3 }
 0x360   : > { %v1520_v12 = vadd.f32 %v1519_v6, %v1496_v1 }
 0x361   : > { %v1522_v23 = vpop.f32.mrf.mxu0 }
 0x362   : > { %v1543_v17 = vadd.f32 %v1542_v13, %v1520_v12 }
 0x367   : > { %v1499_v11 = vpop.f32.mrf.mxu3 }
 0x368   : > { %v1565_v14 = vpop.f32.mrf.mxu2  ;;  %v1523_v27 = vadd.f32 %v1522_v23, %v1499_v11 }
 0x369   : > { %v1566_v20 = vadd.f32 %v1565_v14, %v1543_v17 }
 0x36a   : > { %v1546_v33 = vadd.f32 %v1545_v31, %v1523_v27 }
 0x36f   : > { %v1588_v24 = vpop.f32.mrf.mxu3 }
 0x370   : > { %v1589_v28 = vadd.f32 %v1588_v24, %v1566_v20  ;;  %v1568_v32 = vpop.f32.mrf.mxu2 }
 0x371   : > { %v1569_v35 = vadd.f32 %v1568_v32, %v1546_v33 }
 0x372   : > { %v1598_v30 = vmul.f32 %v2157_v21, %v1589_v28 }
 0x374   : > { %v1604_v34 = vadd.f32 %v2158_v29, %v1598_v30 }
 0x376   : > { %2173 = vtanh.f32 %v1604_v34 }
 0x377   : > { %v1591_v36 = vpop.f32.mrf.mxu3 }
 0x378   : > { %v1592_v37 = vadd.f32 %v1591_v36, %v1569_v35 }
 0x37a   : > { %v1599_v38 = vmul.f32 %v2157_v21, %v1592_v37 }
 0x37c   : > { %v2174_v39 = vpop.eup %2173  ;;  %v1605_v40 = vadd.f32 %v2158_v29, %v1599_v38 }
 0x37d   : > { %1776 = vmatmul.f32.vlgmr.msrb.gmra.mxu2 %v2174_v39  ;;  %v1615_v41 = vrot.slane %v2174_v39, 6  ;;  %v1620_v42 = vrot.slane %v2174_v39, 7  ;;  %v1624_v49 = vrot.slane %v2174_v39, 1  ;;  %v1629_v54 = vrot.slane %v2174_v39, 2 }
 0x37e   : > { %2175 = vtanh.f32 %v1605_v40 }
 0x37f   : > { %v1618_v43 = vsel %vm673_vm1, %v2675_v25, %v1615_v41  ;;  %v1623_v44 = vsel %vm679_vm2, %v2677_v26, %v1620_v42 }
 0x380   : > { %1730 = vmatmul.f32.vlgmr.msrb.gmra.mxu0 %v1618_v43  ;;  %1753 = vmatmul.f32.vlgmr.msrb.gmra.mxu1 %v1623_v44 }
 0x384   : > { %v2176_v45 = vpop.eup %2175 }
 0x385   : > { %1779 = vmatmul.f32.gmra.mxu2 %v2176_v45  ;;  %v1616_v47 = vrot.slane %v2176_v45, 6  ;;  %v1621_v48 = vrot.slane %v2176_v45, 7  ;;  %v1625_v51 = vrot.slane %v2176_v45, 1  ;;  %v1630_v26 = vrot.slane %v2176_v45, 2 }
 0x387   : > { %v1617_v52 = vsel %vm673_vm1, %v1615_v41, %v1616_v47  ;;  %v1622_v53 = vsel %vm679_vm2, %v1620_v42, %v1621_v48  ;;  %v1628_v25 = vsel %vm685_vm3, %v1624_v49, %v1625_v51  ;;  %v1633_v55 = vsel %vm691_vm4, %v1629_v54, %v1630_v26 }
 0x388   : > { %1733 = vmatmul.f32.gmra.mxu0 %v1617_v52  ;;  %1756 = vmatmul.f32.gmra.mxu1 %v1622_v53  ;;  %v1632_v56 = vsel %vm691_vm4, %v1630_v26, %v2706_v50  ;;  %v1627_v57 = vsel %vm685_vm3, %v1625_v51, %v2698_v46  ;;  %v2159_v50 = vld [vmem:[%s2899_s30] ss:$0 sm:$0xff]  ;;  %s2375_s30 = sshra.s32 %s1893_s20, 4  ;;  %s2376_s30 = int_to_ptr.hbm [resolvable:$true] %s2375_s30 }
 0x389   : > { %1799 = vmatmul.f32.vlgmr.msrb.gmra.mxu3 %v1628_v25  ;;  %v2160_v46 = vld [vmem:[%s2900_s19] ss:$0 sm:$0xff]  ;;  %s2377_s0 = scalar_lea.hbm %s2376_s30, 8  ;;  %s2381_s19 = scalar_lea.hbm %s2901_s4, 16 }
 0x38a   : > { %p2378_p1 = scmp.ne.s32.totalorder %s2376_s30, %s2377_s0  ;;  %p2382_p12 = scmp.lt.s32.totalorder %s2376_s30, %s2901_s4 }
 0x38b   : > { %p2383_p8 = scmp.lt.s32.totalorder %s2381_s19, %s2377_s0 }
 0x38c   : > { %p2379_p3 = pnand %p2378_p1, %p2620_p13 }
 0x38d   : > { %p2384_p7 = por %p2383_p8, %p2382_p12 }
 0x38e   : > { %p2380_p5 = pneg %p2379_p3 }
 0x390   : > { %1822 = vmatmul.f32.vlgmr.msra.gmra.mxu0 %v1633_v55  ;;  %1825 = vmatmul.f32.vlgmr.msra.gmra.mxu1 %v1632_v56  ;;  %p2385_p9 = pnand %p2384_p7, %p2380_p5 }
 0x391   : > { %1802 = vmatmul.f32.gmra.mxu3 %v1627_v57 }
 0x3fd   : > { %v1731_v58 = vpop.f32.mrf.mxu0  ;;  %v1754_v59 = vpop.f32.mrf.mxu1 }
 0x3fe   : > { %v1755_v62 = vadd.f32 %v1754_v59, %v1731_v58 }
 0x400   : > { %v1777_v61 = vpop.f32.mrf.mxu2 }
 0x401   : > { %v1778_v63 = vadd.f32 %v1777_v61, %v1755_v62 }
 0x405   : > { %v1734_v60 = vpop.f32.mrf.mxu0  ;;  %v1757_v0 = vpop.f32.mrf.mxu1 }
 0x406   : > { %v1758_v4 = vadd.f32 %v1757_v0, %v1734_v60 }
 0x408   : > { %v1780_v5 = vpop.f32.mrf.mxu2 }
 0x409   : > { %v1781_v7 = vadd.f32 %v1780_v5, %v1758_v4 }
 0x40c   : > { %v1800_v1 = vpop.f32.mrf.mxu3 }
 0x40d   : > { %v1801_v2 = vadd.f32 %v1800_v1, %v1778_v63  ;;  %v1823_v3 = vpop.f32.mrf.mxu0  ;;  %v1826_v11 = vpop.f32.mrf.mxu1 }
 0x40f   : > { %v1824_v18 = vadd.f32 %v1823_v3, %v1801_v2 }
 0x411   : > { %v1833_v6 = vmul.f32 %v2159_v50, %v1824_v18 }
 0x413   : > { %v1839_v8 = vadd.f32 %v2160_v46, %v1833_v6 }
 0x414   : > { %v1803_v9 = vpop.f32.mrf.mxu3 }
 0x415   : > { %2177 = vtanh.f32 %v1839_v8  ;;  %v1804_v10 = vadd.f32 %v1803_v9, %v1781_v7 }
 0x417   : > { %v1827_v12 = vadd.f32 %v1826_v11, %v1804_v10 }
 0x419   : > { %v1834_v13 = vmul.f32 %v2159_v50, %v1827_v12 }
 0x41b   : > { %v2178_v14 = vpop.eup %2177  ;;  %v1840_v15 = vadd.f32 %v2160_v46, %v1834_v13 }
 0x41c   : > { %1843 = vxpose.xlu0.b32.start [1/2] (short) (narrow) %v2178_v14, 8 }
 0x41d   : > { %2179 = vtanh.f32 %v1840_v15 }
 0x423   : > { %v2180_v16 = vpop.eup %2179 }
 0x424   : > { %1844 = vxpose.xlu0.b32.end [2/2] (short) (narrow) %v2180_v16, 8 }
 0x4c0   : > { %v1859_v17 = vpop.trf.xlu0 }
 0x4c1   : > { %1876 = vst.msk [vmem:[%s621_s29] sm:$0xff] %vm1875_vm5, %v1859_v17 }
 0x4c2   : > { %2388 = shalt.err (!%p2385_p9)
}
 0x4c3   : > { %2073 = dma.vmem_to_hbm [thread:$0]  (%p2620_p13), %s1891_s7, 128, %s1893_s20, %s1878_s18  }
 0x4c4 PF: > { %s1904_s15 = sand.u32 1, %s2427_s21   ;;  %p2902_p10 = scmp.ge.s32.totalorder %s2439_s24, 2 }
 0x4c5   : > { %s1905_s27 = scalar_lea.sflag [#allocation6], %s1904_s15 }
 0x4c6   : > { %p2096_p11 = pnand %p2902_p10, %p2625_p4 }
 0x4c8   : > { %p2097_p0 = pneg %p2096_p11 }
 0x4ca   : > { %2422 = dma.done.wait (%p2097_p0), %s1905_s27, 128  }
 0x4cb   : > { %2424 = vsyncadd (%p2097_p0), %s1905_s27, 4294967168  ;;  %s2903_s13 = sld [smem:[#allocation21_spill]]  ;;  %p32_p2 = scmp.ge.s32.totalorder %s2600_s17, 4  }
 0x4cc   : > { %s2904_s21 = smov %s2431_s22  ;;  %s2905_s22 = smov %s2435_s23 }
 0x4cd   : > { %s2907_s24 = smov %s2600_s17  ;;  %34 = sbr.rel (!%p32_p2) target bundleno = 19 (0x13), region = 149 }
 0x4d1   : > { %s2906_s23 = smov %s2903_s13 }
 0x4d2   :  { %1911 = vsyncpa [#allocation5], 1 }
 0x4d3   :  { %1913 = vsyncpa [#allocation5 + $0x1], 1 }
 0x4d4   :  { %1914 = vsyncpa [#allocation8], 1 }
 0x4d5   :  { %1915 = vsyncpa [#allocation11], 1 }
 0x4d6   :  { %1916 = vsyncpa [#allocation14], 1 }
 0x4d7   :  { %1917 = vsyncpa [#allocation6], 1 }
 0x4d8   :  { %1919 = vsyncpa [#allocation6 + $0x1], 1 }

</bundles_post_ra>
